<compile_context>
chip_gen: v6e
topology: v6e:2x2x1
jax: 0.10.0
libtpu: 0.0.40
codegen_flags: <defaults>
</compile_context>

<pallas_src>
import functools

import numpy as np
import jax
import jax.numpy as jnp
from jax.experimental import pallas as pl
from jax.experimental.pallas import tpu as pltpu

# ---------------- KNRM hyper-parameters (match the PyTorch __init__) ----------------
KERNEL_NUM = 21
SIGMA = 0.1
EXACT_SIGMA = 0.001
OUT_LAYERS = [10, 5]

_step = 1.0 / (KERNEL_NUM - 1)
MUS = np.arange(-1, 1, _step)[1::2].tolist() + [1.0]          # 21 kernel centers
SIGMAS = [SIGMA] * (KERNEL_NUM - 1) + [EXACT_SIGMA]           # 21 kernel widths
assert len(MUS) == KERNEL_NUM and len(SIGMAS) == KERNEL_NUM

_NORM_EPS = 1e-12       # F.normalize default eps
_LANE = 128             # TPU lane width
_PAD_SENTINEL = 1e4     # exp(coef*(sentinel-mu)^2) underflows to exactly 0 in f32


# ----------------------------------- Pallas kernel -----------------------------------
def _knrm_pair_kernel(q_ref, dT_ref, w1_ref, b1_ref, w2_ref, b2_ref, w3_ref, b3_ref,
                      out_ref, *, r_real):
    """One predict() pass per grid step (grid axis = the two input pairs).

    q_ref  : [1, B, L, D]   queries of this pair
    dT_ref : [1, B, D, Rp]  docs of this pair, transposed + doc axis lane-padded
    w*/b*  : MLP params, [in, out] / [1, out]
    out_ref: [1, B, 1]      logits for this pair
    """
    q = q_ref[0].astype(jnp.float32)          # [B, L, D]
    d = dT_ref[0].astype(jnp.float32)         # [B, D, Rp]

    # F.normalize(x, p=2, dim=-1): x / max(||x||_2, eps); all-zero rows stay zero.
    qn = q / jnp.maximum(jnp.sqrt(jnp.sum(q * q, axis=-1, keepdims=True)), _NORM_EPS)
    dn = d / jnp.maximum(jnp.sqrt(jnp.sum(d * d, axis=-2, keepdims=True)), _NORM_EPS)

    # Matching matrix on the MXU.  Doc operand already in [B, D, Rp] layout, so the
    # contraction needs no in-kernel transpose.  Full f32 precision: the exact-match
    # kernel (sigma=1e-3) amplifies matmul error by ~5e5, so bf16 passes are unsafe.
    mm = jnp.einsum('bld,bdr->blr', qn, dn,
                    preferred_element_type=jnp.float32,
                    precision=jax.lax.Precision.HIGHEST)          # [B, L, Rp]

    rp = mm.shape[-1]
    if rp > r_real:
        # Mask the synthetic lane-padding columns ONCE on mm (not on the K-expanded
        # tensor): the sentinel makes exp(coef*(mm-mu)^2) flush to exactly 0 for
        # every kernel.  Real padding tokens (embedding row 0 -> M=0) keep their
        # Gaussian contribution, matching the PyTorch reference.
        col = jax.lax.broadcasted_iota(jnp.int32, mm.shape, dimension=2)
        mm = jnp.where(col < r_real, mm, _PAD_SENTINEL)

    # 21 Gaussian kernels, statically unrolled one at a time: peak live set is
    # mm + one [B, L, Rp] response, and mu/coef are Python scalars (no captured
    # array constants).  Layer-1 of the MLP (feats @ W1) is fused in as a sum of
    # rank-1 terms f_k * W1[k, :], so the [B, 21] feature block never materializes.
    h1 = None
    for k in range(KERNEL_NUM):
        mu_k = float(MUS[k])
        coef_k = -0.5 / (float(SIGMAS[k]) ** 2)
        diff = mm - mu_k
        g = jnp.exp(coef_k * (diff * diff))                       # [B, L, Rp]
        s = jnp.sum(g, axis=-1)                                   # [B, L]
        f_k = jnp.sum(jnp.log1p(s), axis=-1, keepdims=True)       # [B, 1]
        term = f_k * w1_ref[k:k + 1, :]                           # [B, 10]
        h1 = term if h1 is None else h1 + term

    # MLP: (21->10) ReLU (10->5) ReLU (5->1)
    h = jnp.maximum(h1 + b1_ref[...], 0.0)                                        # [B, 10]
    h = jnp.maximum(jnp.dot(h, w2_ref[...], preferred_element_type=jnp.float32,
                            precision=jax.lax.Precision.HIGHEST) + b2_ref[...], 0.0)
    logits = jnp.dot(h, w3_ref[...], preferred_element_type=jnp.float32,
                     precision=jax.lax.Precision.HIGHEST) + b3_ref[...]           # [B, 1]

    out_ref[0] = logits


def knrm_forward_pallas(q_pair_emb, d_pair_emb, mlp_params):
    """q_pair_emb: [2, B, L, D], d_pair_emb: [2, B, R, D] (pair axis = the two inputs).

    Returns sigmoid(predict(pair 0) - predict(pair 1)) of shape [B, 1].
    """
    (w1, b1), (w2, b2), (w3, b3) = mlp_params
    P, B, L, D = q_pair_emb.shape
    R = d_pair_emb.shape[2]
    rp = ((R + _LANE - 1) // _LANE) * _LANE                       # lane-dense doc axis

    # MXU-friendly doc layout [pair, B, D, Rp].  At production scale this transpose
    # and pad should be emitted directly by the embedding gather (they fuse with it
    # under jit), so no extra HBM round trip is introduced.
    dT = jnp.swapaxes(d_pair_emb, -1, -2)
    dT = jnp.pad(dT, ((0, 0), (0, 0), (0, 0), (0, rp - R)))       # [P, B, D, Rp]

    kernel = functools.partial(_knrm_pair_kernel, r_real=R)

    # Grid over the pair axis: both predict() passes are independent ("parallel"),
    # so they land on separate TensorCores on v7x and get double-buffered DMA on
    # every generation.  At realistic B/L/R, additionally block the batch axis and
    # set vmem_limit_bytes per generation (v7x: 64 MiB physical / 32 MiB scoped
    # default; v5e: 16 MiB scoped default) -- unnecessary at this scale.
    logits = pl.pallas_call(
        kernel,
        out_shape=jax.ShapeDtypeStruct((P, B, 1), jnp.float32),
        grid=(P,),
        in_specs=[
            pl.BlockSpec((1, B, L, D), lambda p: (p, 0, 0, 0)),
            pl.BlockSpec((1, B, D, rp), lambda p: (p, 0, 0, 0)),
            pl.BlockSpec(w1.shape, lambda p: (0, 0)),
            pl.BlockSpec(b1.shape, lambda p: (0, 0)),
            pl.BlockSpec(w2.shape, lambda p: (0, 0)),
            pl.BlockSpec(b2.shape, lambda p: (0, 0)),
            pl.BlockSpec(w3.shape, lambda p: (0, 0)),
            pl.BlockSpec(b3.shape, lambda p: (0, 0)),
        ],
        out_specs=pl.BlockSpec((1, B, 1), lambda p: (p, 0, 0)),
        compiler_params=pltpu.CompilerParams(
            dimension_semantics=("parallel",)),
    )(q_pair_emb, dT, w1, b1, w2, b2, w3, b3)

    # Tiny epilogue kept in the wrapper so the two pair halves can live on
    # different cores.
    return jax.nn.sigmoid(logits[0] - logits[1])                  # [B, 1]


# -------------------------------- plain-JAX reference --------------------------------
def _ref_predict(q_emb, d_emb, mlp_params):
    hp = jax.lax.Precision.HIGHEST

    def l2norm(x):
        n = jnp.sqrt(jnp.sum(x * x, axis=-1, keepdims=True))
        return x / jnp.maximum(n, _NORM_EPS)

    mm = jnp.einsum('bld,brd->blr', l2norm(q_emb), l2norm(d_emb), precision=hp)
    feats = []
    for mu, sigma in zip(MUS, SIGMAS):
        g = jnp.exp(-0.5 * (mm - mu) ** 2 / (sigma ** 2))
        feats.append(jnp.sum(jnp.log1p(jnp.sum(g, axis=-1)), axis=-1))
    ko = jnp.stack(feats, axis=1)
    (w1, b1), (w2, b2), (w3, b3) = mlp_params
    h = jnp.maximum(jnp.dot(ko, w1, precision=hp) + b1, 0.0)
    h = jnp.maximum(jnp.dot(h, w2, precision=hp) + b2, 0.0)
    return jnp.dot(h, w3, precision=hp) + b3


def _ref_forward(q1_emb, d1_emb, q2_emb, d2_emb, mlp_params):
    return jax.nn.sigmoid(_ref_predict(q1_emb, d1_emb, mlp_params)
                          - _ref_predict(q2_emb, d2_emb, mlp_params))


# -------------------------------------- main ------------------------------------------
if __name__ == "__main__":
    # Small, deterministic synthetic setup.
    B, LQ, LD, D, VOCAB = 2, 8, 12, 32, 50

    key = jax.random.PRNGKey(0)
    (k_emb, k_q1, k_d1, k_q2, k_d2,
     k_w1, k_b1, k_w2, k_b2, k_w3, k_b3) = jax.random.split(key, 11)

    # Embedding matrix (row 0 = padding -> zeros).
    emb_matrix = jax.random.normal(k_emb, (VOCAB, D), dtype=jnp.float32)
    emb_matrix = emb_matrix.at[0].set(0.0)

    # Token ids for the two input pairs.
    q1_ids = jax.random.randint(k_q1, (B, LQ), 0, VOCAB)
    d1_ids = jax.random.randint(k_d1, (B, LD), 0, VOCAB)
    q2_ids = jax.random.randint(k_q2, (B, LQ), 0, VOCAB)
    d2_ids = jax.random.randint(k_d2, (B, LD), 0, VOCAB)

    # TODO(synk): the nn.Embedding token-id gather over the vocab is plain-JAX glue;
    # an in-kernel vocab gather is not worthwhile at these sizes.  The pair axis is
    # produced directly by the gather (no separate concat copy).
    q_pair_emb = emb_matrix[jnp.stack([q1_ids, q2_ids], axis=0)]   # [2, B, LQ, D]
    d_pair_emb = emb_matrix[jnp.stack([d1_ids, d2_ids], axis=0)]   # [2, B, LD, D]

    # MLP params (PyTorch Linear default init: U(-1/sqrt(fan_in), 1/sqrt(fan_in))).
    def linear_init(kw, kb, fan_in, fan_out):
        bound = 1.0 / np.sqrt(fan_in)
        w = jax.random.uniform(kw, (fan_in, fan_out), jnp.float32, -bound, bound)
        b = jax.random.uniform(kb, (1, fan_out), jnp.float32, -bound, bound)
        return w, b

    dims = [KERNEL_NUM] + OUT_LAYERS + [1]            # [21, 10, 5, 1]
    mlp_params = (
        linear_init(k_w1, k_b1, dims[0], dims[1]),
        linear_init(k_w2, k_b2, dims[1], dims[2]),
        linear_init(k_w3, k_b3, dims[2], dims[3]),
    )

    out = knrm_forward_pallas(q_pair_emb, d_pair_emb, mlp_params)
    out = jax.block_until_ready(out)

    ref = _ref_forward(q_pair_emb[0], d_pair_emb[0], q_pair_emb[1], d_pair_emb[1],
                       mlp_params)
    np.testing.assert_allclose(np.asarray(out), np.asarray(ref), rtol=1e-4, atol=1e-5)

    print("KERNEL_OK")
</pallas_src>

<mosaic_0001>
module attributes {stable_mosaic.version = 11 : i64} {
  func.func @_knrm_pair_kernel(%arg0: i32, %arg1: memref<1x2x8x32xf32, #tpu.memory_space<vmem>>, %arg2: memref<1x2x32x128xf32, #tpu.memory_space<vmem>>, %arg3: memref<21x10xf32, #tpu.memory_space<vmem>>, %arg4: memref<1x10xf32, #tpu.memory_space<vmem>>, %arg5: memref<10x5xf32, #tpu.memory_space<vmem>>, %arg6: memref<1x5xf32, #tpu.memory_space<vmem>>, %arg7: memref<5x1xf32, #tpu.memory_space<vmem>>, %arg8: memref<1x1xf32, #tpu.memory_space<vmem>>, %arg9: memref<1x2x1xf32, #tpu.memory_space<vmem>>) attributes {dimension_semantics = [#tpu.dimension_semantics<parallel>], iteration_bounds = array<i64: 2>, scalar_prefetch = 0 : i64, scratch_operands = 0 : i64, tpu.core_type = #tpu.core_type<tc>, window_params = [{transform_indices = @transform_0, window_bounds = array<i64: 1, 2, 8, 32>}, {transform_indices = @transform_1, window_bounds = array<i64: 1, 2, 32, 128>}, {pipeline_mode = #tpu.pipeline_mode<synchronous>, transform_indices = @transform_2, window_bounds = array<i64: 21, 10>}, {pipeline_mode = #tpu.pipeline_mode<synchronous>, transform_indices = @transform_3, window_bounds = array<i64: 1, 10>}, {pipeline_mode = #tpu.pipeline_mode<synchronous>, transform_indices = @transform_4, window_bounds = array<i64: 10, 5>}, {pipeline_mode = #tpu.pipeline_mode<synchronous>, transform_indices = @transform_5, window_bounds = array<i64: 1, 5>}, {pipeline_mode = #tpu.pipeline_mode<synchronous>, transform_indices = @transform_6, window_bounds = array<i64: 5, 1>}, {pipeline_mode = #tpu.pipeline_mode<synchronous>, transform_indices = @transform_7, window_bounds = array<i64: 1, 1>}, {transform_indices = @transform_8, window_bounds = array<i64: 1, 2, 1>}]} {
    %c0 = arith.constant 0 : index
    %c0_0 = arith.constant 0 : index
    %c0_1 = arith.constant 0 : index
    %c0_2 = arith.constant 0 : index
    %0 = vector.load %arg1[%c0, %c0_0, %c0_1, %c0_2] : memref<1x2x8x32xf32, #tpu.memory_space<vmem>>, vector<1x2x8x32xf32>
    %1 = vector.shape_cast %0 : vector<1x2x8x32xf32> to vector<2x8x32xf32>
    %c0_3 = arith.constant 0 : index
    %c0_4 = arith.constant 0 : index
    %c0_5 = arith.constant 0 : index
    %c0_6 = arith.constant 0 : index
    %2 = vector.load %arg2[%c0_3, %c0_4, %c0_5, %c0_6] : memref<1x2x32x128xf32, #tpu.memory_space<vmem>>, vector<1x2x32x128xf32>
    %3 = vector.shape_cast %2 : vector<1x2x32x128xf32> to vector<2x32x128xf32>
    %4 = arith.mulf %1, %1 : vector<2x8x32xf32>
    %cst = arith.constant dense<0.000000e+00> : vector<2x8xf32>
    %5 = vector.multi_reduction <add>, %4, %cst [2] : vector<2x8x32xf32> to vector<2x8xf32>
    %6 = vector.shape_cast %5 : vector<2x8xf32> to vector<2x8x1xf32>
    %7 = math.sqrt %6 : vector<2x8x1xf32>
    %cst_7 = arith.constant 9.99999996E-13 : f32
    %8 = vector.broadcast %cst_7 : f32 to vector<2x8x1xf32>
    %9 = arith.maximumf %7, %8 : vector<2x8x1xf32>
    %10 = vector.broadcast %9 : vector<2x8x1xf32> to vector<2x8x32xf32>
    %11 = arith.divf %1, %10 : vector<2x8x32xf32>
    %12 = arith.mulf %3, %3 : vector<2x32x128xf32>
    %cst_8 = arith.constant dense<0.000000e+00> : vector<2x128xf32>
    %13 = vector.multi_reduction <add>, %12, %cst_8 [1] : vector<2x32x128xf32> to vector<2x128xf32>
    %14 = vector.shape_cast %13 : vector<2x128xf32> to vector<2x1x128xf32>
    %15 = math.sqrt %14 : vector<2x1x128xf32>
    %cst_9 = arith.constant 9.99999996E-13 : f32
    %16 = vector.broadcast %cst_9 : f32 to vector<2x1x128xf32>
    %17 = arith.maximumf %15, %16 : vector<2x1x128xf32>
    %18 = vector.broadcast %17 : vector<2x1x128xf32> to vector<2x32x128xf32>
    %19 = arith.divf %3, %18 : vector<2x32x128xf32>
    "tpu.trace_start"() <{level = 10 : i32, message = "bld,bdr->blr"}> : () -> ()
    %cst_10 = arith.constant dense<0.000000e+00> : vector<2x8x128xf32>
    %20 = tpu.matmul %11, %19, %cst_10 {dimension_numbers = #tpu.dot_dimension_numbers<[2], [1], [1], [2], [0, 0, 0, 1, 1, 2], [0], [0]>, precision = #tpu.contract_precision<fp32>} : vector<2x8x32xf32>, vector<2x32x128xf32>, vector<2x8x128xf32> -> vector<2x8x128xf32>
    "tpu.trace_stop"() : () -> ()
    %21 = tpu.iota {dimensions = array<i32: 2>} : vector<2x8x128xi32>
    %c12_i32 = arith.constant 12 : i32
    %22 = vector.broadcast %c12_i32 : i32 to vector<2x8x128xi32>
    %23 = arith.cmpi slt, %21, %22 : vector<2x8x128xi32>
    %cst_11 = arith.constant 1.000000e+04 : f32
    %24 = vector.broadcast %cst_11 : f32 to vector<2x8x128xf32>
    %25 = arith.select %23, %20, %24 : vector<2x8x128xi1>, vector<2x8x128xf32>
    %cst_12 = arith.constant -0.949999988 : f32
    %26 = vector.broadcast %cst_12 : f32 to vector<2x8x128xf32>
    %27 = arith.subf %25, %26 : vector<2x8x128xf32>
    %28 = arith.mulf %27, %27 : vector<2x8x128xf32>
    %cst_13 = arith.constant -5.000000e+01 : f32
    %29 = vector.broadcast %cst_13 : f32 to vector<2x8x128xf32>
    %30 = arith.mulf %29, %28 : vector<2x8x128xf32>
    %31 = math.exp %30 : vector<2x8x128xf32>
    %cst_14 = arith.constant dense<0.000000e+00> : vector<2x8xf32>
    %32 = vector.multi_reduction <add>, %31, %cst_14 [2] : vector<2x8x128xf32> to vector<2x8xf32>
    %33 = math.log1p %32 : vector<2x8xf32>
    %cst_15 = arith.constant dense<0.000000e+00> : vector<2xf32>
    %34 = vector.multi_reduction <add>, %33, %cst_15 [1] : vector<2x8xf32> to vector<2xf32>
    %35 = vector.shape_cast %34 : vector<2xf32> to vector<2x1xf32>
    %c0_16 = arith.constant 0 : index
    %c0_17 = arith.constant 0 : index
    %36 = vector.load %arg3[%c0_16, %c0_17] : memref<21x10xf32, #tpu.memory_space<vmem>>, vector<1x10xf32>
    %37 = vector.broadcast %35 : vector<2x1xf32> to vector<2x10xf32>
    %38 = vector.broadcast %36 : vector<1x10xf32> to vector<2x10xf32>
    %39 = arith.mulf %37, %38 : vector<2x10xf32>
    %cst_18 = arith.constant -8.500000e-01 : f32
    %40 = vector.broadcast %cst_18 : f32 to vector<2x8x128xf32>
    %41 = arith.subf %25, %40 : vector<2x8x128xf32>
    %42 = arith.mulf %41, %41 : vector<2x8x128xf32>
    %cst_19 = arith.constant -5.000000e+01 : f32
    %43 = vector.broadcast %cst_19 : f32 to vector<2x8x128xf32>
    %44 = arith.mulf %43, %42 : vector<2x8x128xf32>
    %45 = math.exp %44 : vector<2x8x128xf32>
    %cst_20 = arith.constant dense<0.000000e+00> : vector<2x8xf32>
    %46 = vector.multi_reduction <add>, %45, %cst_20 [2] : vector<2x8x128xf32> to vector<2x8xf32>
    %47 = math.log1p %46 : vector<2x8xf32>
    %cst_21 = arith.constant dense<0.000000e+00> : vector<2xf32>
    %48 = vector.multi_reduction <add>, %47, %cst_21 [1] : vector<2x8xf32> to vector<2xf32>
    %49 = vector.shape_cast %48 : vector<2xf32> to vector<2x1xf32>
    %c1 = arith.constant 1 : index
    %c0_22 = arith.constant 0 : index
    %50 = vector.load %arg3[%c1, %c0_22] : memref<21x10xf32, #tpu.memory_space<vmem>>, vector<1x10xf32>
    %51 = vector.broadcast %49 : vector<2x1xf32> to vector<2x10xf32>
    %52 = vector.broadcast %50 : vector<1x10xf32> to vector<2x10xf32>
    %53 = arith.mulf %51, %52 : vector<2x10xf32>
    %54 = arith.addf %39, %53 : vector<2x10xf32>
    %cst_23 = arith.constant -7.500000e-01 : f32
    %55 = vector.broadcast %cst_23 : f32 to vector<2x8x128xf32>
    %56 = arith.subf %25, %55 : vector<2x8x128xf32>
    %57 = arith.mulf %56, %56 : vector<2x8x128xf32>
    %cst_24 = arith.constant -5.000000e+01 : f32
    %58 = vector.broadcast %cst_24 : f32 to vector<2x8x128xf32>
    %59 = arith.mulf %58, %57 : vector<2x8x128xf32>
    %60 = math.exp %59 : vector<2x8x128xf32>
    %cst_25 = arith.constant dense<0.000000e+00> : vector<2x8xf32>
    %61 = vector.multi_reduction <add>, %60, %cst_25 [2] : vector<2x8x128xf32> to vector<2x8xf32>
    %62 = math.log1p %61 : vector<2x8xf32>
    %cst_26 = arith.constant dense<0.000000e+00> : vector<2xf32>
    %63 = vector.multi_reduction <add>, %62, %cst_26 [1] : vector<2x8xf32> to vector<2xf32>
    %64 = vector.shape_cast %63 : vector<2xf32> to vector<2x1xf32>
    %c2 = arith.constant 2 : index
    %c0_27 = arith.constant 0 : index
    %65 = vector.load %arg3[%c2, %c0_27] : memref<21x10xf32, #tpu.memory_space<vmem>>, vector<1x10xf32>
    %66 = vector.broadcast %64 : vector<2x1xf32> to vector<2x10xf32>
    %67 = vector.broadcast %65 : vector<1x10xf32> to vector<2x10xf32>
    %68 = arith.mulf %66, %67 : vector<2x10xf32>
    %69 = arith.addf %54, %68 : vector<2x10xf32>
    %cst_28 = arith.constant -6.500000e-01 : f32
    %70 = vector.broadcast %cst_28 : f32 to vector<2x8x128xf32>
    %71 = arith.subf %25, %70 : vector<2x8x128xf32>
    %72 = arith.mulf %71, %71 : vector<2x8x128xf32>
    %cst_29 = arith.constant -5.000000e+01 : f32
    %73 = vector.broadcast %cst_29 : f32 to vector<2x8x128xf32>
    %74 = arith.mulf %73, %72 : vector<2x8x128xf32>
    %75 = math.exp %74 : vector<2x8x128xf32>
    %cst_30 = arith.constant dense<0.000000e+00> : vector<2x8xf32>
    %76 = vector.multi_reduction <add>, %75, %cst_30 [2] : vector<2x8x128xf32> to vector<2x8xf32>
    %77 = math.log1p %76 : vector<2x8xf32>
    %cst_31 = arith.constant dense<0.000000e+00> : vector<2xf32>
    %78 = vector.multi_reduction <add>, %77, %cst_31 [1] : vector<2x8xf32> to vector<2xf32>
    %79 = vector.shape_cast %78 : vector<2xf32> to vector<2x1xf32>
    %c3 = arith.constant 3 : index
    %c0_32 = arith.constant 0 : index
    %80 = vector.load %arg3[%c3, %c0_32] : memref<21x10xf32, #tpu.memory_space<vmem>>, vector<1x10xf32>
    %81 = vector.broadcast %79 : vector<2x1xf32> to vector<2x10xf32>
    %82 = vector.broadcast %80 : vector<1x10xf32> to vector<2x10xf32>
    %83 = arith.mulf %81, %82 : vector<2x10xf32>
    %84 = arith.addf %69, %83 : vector<2x10xf32>
    %cst_33 = arith.constant -5.500000e-01 : f32
    %85 = vector.broadcast %cst_33 : f32 to vector<2x8x128xf32>
    %86 = arith.subf %25, %85 : vector<2x8x128xf32>
    %87 = arith.mulf %86, %86 : vector<2x8x128xf32>
    %cst_34 = arith.constant -5.000000e+01 : f32
    %88 = vector.broadcast %cst_34 : f32 to vector<2x8x128xf32>
    %89 = arith.mulf %88, %87 : vector<2x8x128xf32>
    %90 = math.exp %89 : vector<2x8x128xf32>
    %cst_35 = arith.constant dense<0.000000e+00> : vector<2x8xf32>
    %91 = vector.multi_reduction <add>, %90, %cst_35 [2] : vector<2x8x128xf32> to vector<2x8xf32>
    %92 = math.log1p %91 : vector<2x8xf32>
    %cst_36 = arith.constant dense<0.000000e+00> : vector<2xf32>
    %93 = vector.multi_reduction <add>, %92, %cst_36 [1] : vector<2x8xf32> to vector<2xf32>
    %94 = vector.shape_cast %93 : vector<2xf32> to vector<2x1xf32>
    %c4 = arith.constant 4 : index
    %c0_37 = arith.constant 0 : index
    %95 = vector.load %arg3[%c4, %c0_37] : memref<21x10xf32, #tpu.memory_space<vmem>>, vector<1x10xf32>
    %96 = vector.broadcast %94 : vector<2x1xf32> to vector<2x10xf32>
    %97 = vector.broadcast %95 : vector<1x10xf32> to vector<2x10xf32>
    %98 = arith.mulf %96, %97 : vector<2x10xf32>
    %99 = arith.addf %84, %98 : vector<2x10xf32>
    %cst_38 = arith.constant -4.500000e-01 : f32
    %100 = vector.broadcast %cst_38 : f32 to vector<2x8x128xf32>
    %101 = arith.subf %25, %100 : vector<2x8x128xf32>
    %102 = arith.mulf %101, %101 : vector<2x8x128xf32>
    %cst_39 = arith.constant -5.000000e+01 : f32
    %103 = vector.broadcast %cst_39 : f32 to vector<2x8x128xf32>
    %104 = arith.mulf %103, %102 : vector<2x8x128xf32>
    %105 = math.exp %104 : vector<2x8x128xf32>
    %cst_40 = arith.constant dense<0.000000e+00> : vector<2x8xf32>
    %106 = vector.multi_reduction <add>, %105, %cst_40 [2] : vector<2x8x128xf32> to vector<2x8xf32>
    %107 = math.log1p %106 : vector<2x8xf32>
    %cst_41 = arith.constant dense<0.000000e+00> : vector<2xf32>
    %108 = vector.multi_reduction <add>, %107, %cst_41 [1] : vector<2x8xf32> to vector<2xf32>
    %109 = vector.shape_cast %108 : vector<2xf32> to vector<2x1xf32>
    %c5 = arith.constant 5 : index
    %c0_42 = arith.constant 0 : index
    %110 = vector.load %arg3[%c5, %c0_42] : memref<21x10xf32, #tpu.memory_space<vmem>>, vector<1x10xf32>
    %111 = vector.broadcast %109 : vector<2x1xf32> to vector<2x10xf32>
    %112 = vector.broadcast %110 : vector<1x10xf32> to vector<2x10xf32>
    %113 = arith.mulf %111, %112 : vector<2x10xf32>
    %114 = arith.addf %99, %113 : vector<2x10xf32>
    %cst_43 = arith.constant -3.500000e-01 : f32
    %115 = vector.broadcast %cst_43 : f32 to vector<2x8x128xf32>
    %116 = arith.subf %25, %115 : vector<2x8x128xf32>
    %117 = arith.mulf %116, %116 : vector<2x8x128xf32>
    %cst_44 = arith.constant -5.000000e+01 : f32
    %118 = vector.broadcast %cst_44 : f32 to vector<2x8x128xf32>
    %119 = arith.mulf %118, %117 : vector<2x8x128xf32>
    %120 = math.exp %119 : vector<2x8x128xf32>
    %cst_45 = arith.constant dense<0.000000e+00> : vector<2x8xf32>
    %121 = vector.multi_reduction <add>, %120, %cst_45 [2] : vector<2x8x128xf32> to vector<2x8xf32>
    %122 = math.log1p %121 : vector<2x8xf32>
    %cst_46 = arith.constant dense<0.000000e+00> : vector<2xf32>
    %123 = vector.multi_reduction <add>, %122, %cst_46 [1] : vector<2x8xf32> to vector<2xf32>
    %124 = vector.shape_cast %123 : vector<2xf32> to vector<2x1xf32>
    %c6 = arith.constant 6 : index
    %c0_47 = arith.constant 0 : index
    %125 = vector.load %arg3[%c6, %c0_47] : memref<21x10xf32, #tpu.memory_space<vmem>>, vector<1x10xf32>
    %126 = vector.broadcast %124 : vector<2x1xf32> to vector<2x10xf32>
    %127 = vector.broadcast %125 : vector<1x10xf32> to vector<2x10xf32>
    %128 = arith.mulf %126, %127 : vector<2x10xf32>
    %129 = arith.addf %114, %128 : vector<2x10xf32>
    %cst_48 = arith.constant -2.500000e-01 : f32
    %130 = vector.broadcast %cst_48 : f32 to vector<2x8x128xf32>
    %131 = arith.subf %25, %130 : vector<2x8x128xf32>
    %132 = arith.mulf %131, %131 : vector<2x8x128xf32>
    %cst_49 = arith.constant -5.000000e+01 : f32
    %133 = vector.broadcast %cst_49 : f32 to vector<2x8x128xf32>
    %134 = arith.mulf %133, %132 : vector<2x8x128xf32>
    %135 = math.exp %134 : vector<2x8x128xf32>
    %cst_50 = arith.constant dense<0.000000e+00> : vector<2x8xf32>
    %136 = vector.multi_reduction <add>, %135, %cst_50 [2] : vector<2x8x128xf32> to vector<2x8xf32>
    %137 = math.log1p %136 : vector<2x8xf32>
    %cst_51 = arith.constant dense<0.000000e+00> : vector<2xf32>
    %138 = vector.multi_reduction <add>, %137, %cst_51 [1] : vector<2x8xf32> to vector<2xf32>
    %139 = vector.shape_cast %138 : vector<2xf32> to vector<2x1xf32>
    %c7 = arith.constant 7 : index
    %c0_52 = arith.constant 0 : index
    %140 = vector.load %arg3[%c7, %c0_52] : memref<21x10xf32, #tpu.memory_space<vmem>>, vector<1x10xf32>
    %141 = vector.broadcast %139 : vector<2x1xf32> to vector<2x10xf32>
    %142 = vector.broadcast %140 : vector<1x10xf32> to vector<2x10xf32>
    %143 = arith.mulf %141, %142 : vector<2x10xf32>
    %144 = arith.addf %129, %143 : vector<2x10xf32>
    %cst_53 = arith.constant -1.500000e-01 : f32
    %145 = vector.broadcast %cst_53 : f32 to vector<2x8x128xf32>
    %146 = arith.subf %25, %145 : vector<2x8x128xf32>
    %147 = arith.mulf %146, %146 : vector<2x8x128xf32>
    %cst_54 = arith.constant -5.000000e+01 : f32
    %148 = vector.broadcast %cst_54 : f32 to vector<2x8x128xf32>
    %149 = arith.mulf %148, %147 : vector<2x8x128xf32>
    %150 = math.exp %149 : vector<2x8x128xf32>
    %cst_55 = arith.constant dense<0.000000e+00> : vector<2x8xf32>
    %151 = vector.multi_reduction <add>, %150, %cst_55 [2] : vector<2x8x128xf32> to vector<2x8xf32>
    %152 = math.log1p %151 : vector<2x8xf32>
    %cst_56 = arith.constant dense<0.000000e+00> : vector<2xf32>
    %153 = vector.multi_reduction <add>, %152, %cst_56 [1] : vector<2x8xf32> to vector<2xf32>
    %154 = vector.shape_cast %153 : vector<2xf32> to vector<2x1xf32>
    %c8 = arith.constant 8 : index
    %c0_57 = arith.constant 0 : index
    %155 = vector.load %arg3[%c8, %c0_57] : memref<21x10xf32, #tpu.memory_space<vmem>>, vector<1x10xf32>
    %156 = vector.broadcast %154 : vector<2x1xf32> to vector<2x10xf32>
    %157 = vector.broadcast %155 : vector<1x10xf32> to vector<2x10xf32>
    %158 = arith.mulf %156, %157 : vector<2x10xf32>
    %159 = arith.addf %144, %158 : vector<2x10xf32>
    %cst_58 = arith.constant -5.000000e-02 : f32
    %160 = vector.broadcast %cst_58 : f32 to vector<2x8x128xf32>
    %161 = arith.subf %25, %160 : vector<2x8x128xf32>
    %162 = arith.mulf %161, %161 : vector<2x8x128xf32>
    %cst_59 = arith.constant -5.000000e+01 : f32
    %163 = vector.broadcast %cst_59 : f32 to vector<2x8x128xf32>
    %164 = arith.mulf %163, %162 : vector<2x8x128xf32>
    %165 = math.exp %164 : vector<2x8x128xf32>
    %cst_60 = arith.constant dense<0.000000e+00> : vector<2x8xf32>
    %166 = vector.multi_reduction <add>, %165, %cst_60 [2] : vector<2x8x128xf32> to vector<2x8xf32>
    %167 = math.log1p %166 : vector<2x8xf32>
    %cst_61 = arith.constant dense<0.000000e+00> : vector<2xf32>
    %168 = vector.multi_reduction <add>, %167, %cst_61 [1] : vector<2x8xf32> to vector<2xf32>
    %169 = vector.shape_cast %168 : vector<2xf32> to vector<2x1xf32>
    %c9 = arith.constant 9 : index
    %c0_62 = arith.constant 0 : index
    %170 = vector.load %arg3[%c9, %c0_62] : memref<21x10xf32, #tpu.memory_space<vmem>>, vector<1x10xf32>
    %171 = vector.broadcast %169 : vector<2x1xf32> to vector<2x10xf32>
    %172 = vector.broadcast %170 : vector<1x10xf32> to vector<2x10xf32>
    %173 = arith.mulf %171, %172 : vector<2x10xf32>
    %174 = arith.addf %159, %173 : vector<2x10xf32>
    %cst_63 = arith.constant 5.000000e-02 : f32
    %175 = vector.broadcast %cst_63 : f32 to vector<2x8x128xf32>
    %176 = arith.subf %25, %175 : vector<2x8x128xf32>
    %177 = arith.mulf %176, %176 : vector<2x8x128xf32>
    %cst_64 = arith.constant -5.000000e+01 : f32
    %178 = vector.broadcast %cst_64 : f32 to vector<2x8x128xf32>
    %179 = arith.mulf %178, %177 : vector<2x8x128xf32>
    %180 = math.exp %179 : vector<2x8x128xf32>
    %cst_65 = arith.constant dense<0.000000e+00> : vector<2x8xf32>
    %181 = vector.multi_reduction <add>, %180, %cst_65 [2] : vector<2x8x128xf32> to vector<2x8xf32>
    %182 = math.log1p %181 : vector<2x8xf32>
    %cst_66 = arith.constant dense<0.000000e+00> : vector<2xf32>
    %183 = vector.multi_reduction <add>, %182, %cst_66 [1] : vector<2x8xf32> to vector<2xf32>
    %184 = vector.shape_cast %183 : vector<2xf32> to vector<2x1xf32>
    %c10 = arith.constant 10 : index
    %c0_67 = arith.constant 0 : index
    %185 = vector.load %arg3[%c10, %c0_67] : memref<21x10xf32, #tpu.memory_space<vmem>>, vector<1x10xf32>
    %186 = vector.broadcast %184 : vector<2x1xf32> to vector<2x10xf32>
    %187 = vector.broadcast %185 : vector<1x10xf32> to vector<2x10xf32>
    %188 = arith.mulf %186, %187 : vector<2x10xf32>
    %189 = arith.addf %174, %188 : vector<2x10xf32>
    %cst_68 = arith.constant 1.500000e-01 : f32
    %190 = vector.broadcast %cst_68 : f32 to vector<2x8x128xf32>
    %191 = arith.subf %25, %190 : vector<2x8x128xf32>
    %192 = arith.mulf %191, %191 : vector<2x8x128xf32>
    %cst_69 = arith.constant -5.000000e+01 : f32
    %193 = vector.broadcast %cst_69 : f32 to vector<2x8x128xf32>
    %194 = arith.mulf %193, %192 : vector<2x8x128xf32>
    %195 = math.exp %194 : vector<2x8x128xf32>
    %cst_70 = arith.constant dense<0.000000e+00> : vector<2x8xf32>
    %196 = vector.multi_reduction <add>, %195, %cst_70 [2] : vector<2x8x128xf32> to vector<2x8xf32>
    %197 = math.log1p %196 : vector<2x8xf32>
    %cst_71 = arith.constant dense<0.000000e+00> : vector<2xf32>
    %198 = vector.multi_reduction <add>, %197, %cst_71 [1] : vector<2x8xf32> to vector<2xf32>
    %199 = vector.shape_cast %198 : vector<2xf32> to vector<2x1xf32>
    %c11 = arith.constant 11 : index
    %c0_72 = arith.constant 0 : index
    %200 = vector.load %arg3[%c11, %c0_72] : memref<21x10xf32, #tpu.memory_space<vmem>>, vector<1x10xf32>
    %201 = vector.broadcast %199 : vector<2x1xf32> to vector<2x10xf32>
    %202 = vector.broadcast %200 : vector<1x10xf32> to vector<2x10xf32>
    %203 = arith.mulf %201, %202 : vector<2x10xf32>
    %204 = arith.addf %189, %203 : vector<2x10xf32>
    %cst_73 = arith.constant 2.500000e-01 : f32
    %205 = vector.broadcast %cst_73 : f32 to vector<2x8x128xf32>
    %206 = arith.subf %25, %205 : vector<2x8x128xf32>
    %207 = arith.mulf %206, %206 : vector<2x8x128xf32>
    %cst_74 = arith.constant -5.000000e+01 : f32
    %208 = vector.broadcast %cst_74 : f32 to vector<2x8x128xf32>
    %209 = arith.mulf %208, %207 : vector<2x8x128xf32>
    %210 = math.exp %209 : vector<2x8x128xf32>
    %cst_75 = arith.constant dense<0.000000e+00> : vector<2x8xf32>
    %211 = vector.multi_reduction <add>, %210, %cst_75 [2] : vector<2x8x128xf32> to vector<2x8xf32>
    %212 = math.log1p %211 : vector<2x8xf32>
    %cst_76 = arith.constant dense<0.000000e+00> : vector<2xf32>
    %213 = vector.multi_reduction <add>, %212, %cst_76 [1] : vector<2x8xf32> to vector<2xf32>
    %214 = vector.shape_cast %213 : vector<2xf32> to vector<2x1xf32>
    %c12 = arith.constant 12 : index
    %c0_77 = arith.constant 0 : index
    %215 = vector.load %arg3[%c12, %c0_77] : memref<21x10xf32, #tpu.memory_space<vmem>>, vector<1x10xf32>
    %216 = vector.broadcast %214 : vector<2x1xf32> to vector<2x10xf32>
    %217 = vector.broadcast %215 : vector<1x10xf32> to vector<2x10xf32>
    %218 = arith.mulf %216, %217 : vector<2x10xf32>
    %219 = arith.addf %204, %218 : vector<2x10xf32>
    %cst_78 = arith.constant 3.500000e-01 : f32
    %220 = vector.broadcast %cst_78 : f32 to vector<2x8x128xf32>
    %221 = arith.subf %25, %220 : vector<2x8x128xf32>
    %222 = arith.mulf %221, %221 : vector<2x8x128xf32>
    %cst_79 = arith.constant -5.000000e+01 : f32
    %223 = vector.broadcast %cst_79 : f32 to vector<2x8x128xf32>
    %224 = arith.mulf %223, %222 : vector<2x8x128xf32>
    %225 = math.exp %224 : vector<2x8x128xf32>
    %cst_80 = arith.constant dense<0.000000e+00> : vector<2x8xf32>
    %226 = vector.multi_reduction <add>, %225, %cst_80 [2] : vector<2x8x128xf32> to vector<2x8xf32>
    %227 = math.log1p %226 : vector<2x8xf32>
    %cst_81 = arith.constant dense<0.000000e+00> : vector<2xf32>
    %228 = vector.multi_reduction <add>, %227, %cst_81 [1] : vector<2x8xf32> to vector<2xf32>
    %229 = vector.shape_cast %228 : vector<2xf32> to vector<2x1xf32>
    %c13 = arith.constant 13 : index
    %c0_82 = arith.constant 0 : index
    %230 = vector.load %arg3[%c13, %c0_82] : memref<21x10xf32, #tpu.memory_space<vmem>>, vector<1x10xf32>
    %231 = vector.broadcast %229 : vector<2x1xf32> to vector<2x10xf32>
    %232 = vector.broadcast %230 : vector<1x10xf32> to vector<2x10xf32>
    %233 = arith.mulf %231, %232 : vector<2x10xf32>
    %234 = arith.addf %219, %233 : vector<2x10xf32>
    %cst_83 = arith.constant 4.500000e-01 : f32
    %235 = vector.broadcast %cst_83 : f32 to vector<2x8x128xf32>
    %236 = arith.subf %25, %235 : vector<2x8x128xf32>
    %237 = arith.mulf %236, %236 : vector<2x8x128xf32>
    %cst_84 = arith.constant -5.000000e+01 : f32
    %238 = vector.broadcast %cst_84 : f32 to vector<2x8x128xf32>
    %239 = arith.mulf %238, %237 : vector<2x8x128xf32>
    %240 = math.exp %239 : vector<2x8x128xf32>
    %cst_85 = arith.constant dense<0.000000e+00> : vector<2x8xf32>
    %241 = vector.multi_reduction <add>, %240, %cst_85 [2] : vector<2x8x128xf32> to vector<2x8xf32>
    %242 = math.log1p %241 : vector<2x8xf32>
    %cst_86 = arith.constant dense<0.000000e+00> : vector<2xf32>
    %243 = vector.multi_reduction <add>, %242, %cst_86 [1] : vector<2x8xf32> to vector<2xf32>
    %244 = vector.shape_cast %243 : vector<2xf32> to vector<2x1xf32>
    %c14 = arith.constant 14 : index
    %c0_87 = arith.constant 0 : index
    %245 = vector.load %arg3[%c14, %c0_87] : memref<21x10xf32, #tpu.memory_space<vmem>>, vector<1x10xf32>
    %246 = vector.broadcast %244 : vector<2x1xf32> to vector<2x10xf32>
    %247 = vector.broadcast %245 : vector<1x10xf32> to vector<2x10xf32>
    %248 = arith.mulf %246, %247 : vector<2x10xf32>
    %249 = arith.addf %234, %248 : vector<2x10xf32>
    %cst_88 = arith.constant 5.500000e-01 : f32
    %250 = vector.broadcast %cst_88 : f32 to vector<2x8x128xf32>
    %251 = arith.subf %25, %250 : vector<2x8x128xf32>
    %252 = arith.mulf %251, %251 : vector<2x8x128xf32>
    %cst_89 = arith.constant -5.000000e+01 : f32
    %253 = vector.broadcast %cst_89 : f32 to vector<2x8x128xf32>
    %254 = arith.mulf %253, %252 : vector<2x8x128xf32>
    %255 = math.exp %254 : vector<2x8x128xf32>
    %cst_90 = arith.constant dense<0.000000e+00> : vector<2x8xf32>
    %256 = vector.multi_reduction <add>, %255, %cst_90 [2] : vector<2x8x128xf32> to vector<2x8xf32>
    %257 = math.log1p %256 : vector<2x8xf32>
    %cst_91 = arith.constant dense<0.000000e+00> : vector<2xf32>
    %258 = vector.multi_reduction <add>, %257, %cst_91 [1] : vector<2x8xf32> to vector<2xf32>
    %259 = vector.shape_cast %258 : vector<2xf32> to vector<2x1xf32>
    %c15 = arith.constant 15 : index
    %c0_92 = arith.constant 0 : index
    %260 = vector.load %arg3[%c15, %c0_92] : memref<21x10xf32, #tpu.memory_space<vmem>>, vector<1x10xf32>
    %261 = vector.broadcast %259 : vector<2x1xf32> to vector<2x10xf32>
    %262 = vector.broadcast %260 : vector<1x10xf32> to vector<2x10xf32>
    %263 = arith.mulf %261, %262 : vector<2x10xf32>
    %264 = arith.addf %249, %263 : vector<2x10xf32>
    %cst_93 = arith.constant 6.500000e-01 : f32
    %265 = vector.broadcast %cst_93 : f32 to vector<2x8x128xf32>
    %266 = arith.subf %25, %265 : vector<2x8x128xf32>
    %267 = arith.mulf %266, %266 : vector<2x8x128xf32>
    %cst_94 = arith.constant -5.000000e+01 : f32
    %268 = vector.broadcast %cst_94 : f32 to vector<2x8x128xf32>
    %269 = arith.mulf %268, %267 : vector<2x8x128xf32>
    %270 = math.exp %269 : vector<2x8x128xf32>
    %cst_95 = arith.constant dense<0.000000e+00> : vector<2x8xf32>
    %271 = vector.multi_reduction <add>, %270, %cst_95 [2] : vector<2x8x128xf32> to vector<2x8xf32>
    %272 = math.log1p %271 : vector<2x8xf32>
    %cst_96 = arith.constant dense<0.000000e+00> : vector<2xf32>
    %273 = vector.multi_reduction <add>, %272, %cst_96 [1] : vector<2x8xf32> to vector<2xf32>
    %274 = vector.shape_cast %273 : vector<2xf32> to vector<2x1xf32>
    %c16 = arith.constant 16 : index
    %c0_97 = arith.constant 0 : index
    %275 = vector.load %arg3[%c16, %c0_97] : memref<21x10xf32, #tpu.memory_space<vmem>>, vector<1x10xf32>
    %276 = vector.broadcast %274 : vector<2x1xf32> to vector<2x10xf32>
    %277 = vector.broadcast %275 : vector<1x10xf32> to vector<2x10xf32>
    %278 = arith.mulf %276, %277 : vector<2x10xf32>
    %279 = arith.addf %264, %278 : vector<2x10xf32>
    %cst_98 = arith.constant 7.500000e-01 : f32
    %280 = vector.broadcast %cst_98 : f32 to vector<2x8x128xf32>
    %281 = arith.subf %25, %280 : vector<2x8x128xf32>
    %282 = arith.mulf %281, %281 : vector<2x8x128xf32>
    %cst_99 = arith.constant -5.000000e+01 : f32
    %283 = vector.broadcast %cst_99 : f32 to vector<2x8x128xf32>
    %284 = arith.mulf %283, %282 : vector<2x8x128xf32>
    %285 = math.exp %284 : vector<2x8x128xf32>
    %cst_100 = arith.constant dense<0.000000e+00> : vector<2x8xf32>
    %286 = vector.multi_reduction <add>, %285, %cst_100 [2] : vector<2x8x128xf32> to vector<2x8xf32>
    %287 = math.log1p %286 : vector<2x8xf32>
    %cst_101 = arith.constant dense<0.000000e+00> : vector<2xf32>
    %288 = vector.multi_reduction <add>, %287, %cst_101 [1] : vector<2x8xf32> to vector<2xf32>
    %289 = vector.shape_cast %288 : vector<2xf32> to vector<2x1xf32>
    %c17 = arith.constant 17 : index
    %c0_102 = arith.constant 0 : index
    %290 = vector.load %arg3[%c17, %c0_102] : memref<21x10xf32, #tpu.memory_space<vmem>>, vector<1x10xf32>
    %291 = vector.broadcast %289 : vector<2x1xf32> to vector<2x10xf32>
    %292 = vector.broadcast %290 : vector<1x10xf32> to vector<2x10xf32>
    %293 = arith.mulf %291, %292 : vector<2x10xf32>
    %294 = arith.addf %279, %293 : vector<2x10xf32>
    %cst_103 = arith.constant 8.500000e-01 : f32
    %295 = vector.broadcast %cst_103 : f32 to vector<2x8x128xf32>
    %296 = arith.subf %25, %295 : vector<2x8x128xf32>
    %297 = arith.mulf %296, %296 : vector<2x8x128xf32>
    %cst_104 = arith.constant -5.000000e+01 : f32
    %298 = vector.broadcast %cst_104 : f32 to vector<2x8x128xf32>
    %299 = arith.mulf %298, %297 : vector<2x8x128xf32>
    %300 = math.exp %299 : vector<2x8x128xf32>
    %cst_105 = arith.constant dense<0.000000e+00> : vector<2x8xf32>
    %301 = vector.multi_reduction <add>, %300, %cst_105 [2] : vector<2x8x128xf32> to vector<2x8xf32>
    %302 = math.log1p %301 : vector<2x8xf32>
    %cst_106 = arith.constant dense<0.000000e+00> : vector<2xf32>
    %303 = vector.multi_reduction <add>, %302, %cst_106 [1] : vector<2x8xf32> to vector<2xf32>
    %304 = vector.shape_cast %303 : vector<2xf32> to vector<2x1xf32>
    %c18 = arith.constant 18 : index
    %c0_107 = arith.constant 0 : index
    %305 = vector.load %arg3[%c18, %c0_107] : memref<21x10xf32, #tpu.memory_space<vmem>>, vector<1x10xf32>
    %306 = vector.broadcast %304 : vector<2x1xf32> to vector<2x10xf32>
    %307 = vector.broadcast %305 : vector<1x10xf32> to vector<2x10xf32>
    %308 = arith.mulf %306, %307 : vector<2x10xf32>
    %309 = arith.addf %294, %308 : vector<2x10xf32>
    %cst_108 = arith.constant 0.949999988 : f32
    %310 = vector.broadcast %cst_108 : f32 to vector<2x8x128xf32>
    %311 = arith.subf %25, %310 : vector<2x8x128xf32>
    %312 = arith.mulf %311, %311 : vector<2x8x128xf32>
    %cst_109 = arith.constant -5.000000e+01 : f32
    %313 = vector.broadcast %cst_109 : f32 to vector<2x8x128xf32>
    %314 = arith.mulf %313, %312 : vector<2x8x128xf32>
    %315 = math.exp %314 : vector<2x8x128xf32>
    %cst_110 = arith.constant dense<0.000000e+00> : vector<2x8xf32>
    %316 = vector.multi_reduction <add>, %315, %cst_110 [2] : vector<2x8x128xf32> to vector<2x8xf32>
    %317 = math.log1p %316 : vector<2x8xf32>
    %cst_111 = arith.constant dense<0.000000e+00> : vector<2xf32>
    %318 = vector.multi_reduction <add>, %317, %cst_111 [1] : vector<2x8xf32> to vector<2xf32>
    %319 = vector.shape_cast %318 : vector<2xf32> to vector<2x1xf32>
    %c19 = arith.constant 19 : index
    %c0_112 = arith.constant 0 : index
    %320 = vector.load %arg3[%c19, %c0_112] : memref<21x10xf32, #tpu.memory_space<vmem>>, vector<1x10xf32>
    %321 = vector.broadcast %319 : vector<2x1xf32> to vector<2x10xf32>
    %322 = vector.broadcast %320 : vector<1x10xf32> to vector<2x10xf32>
    %323 = arith.mulf %321, %322 : vector<2x10xf32>
    %324 = arith.addf %309, %323 : vector<2x10xf32>
    %cst_113 = arith.constant 1.000000e+00 : f32
    %325 = vector.broadcast %cst_113 : f32 to vector<2x8x128xf32>
    %326 = arith.subf %25, %325 : vector<2x8x128xf32>
    %327 = arith.mulf %326, %326 : vector<2x8x128xf32>
    %cst_114 = arith.constant -5.000000e+05 : f32
    %328 = vector.broadcast %cst_114 : f32 to vector<2x8x128xf32>
    %329 = arith.mulf %328, %327 : vector<2x8x128xf32>
    %330 = math.exp %329 : vector<2x8x128xf32>
    %cst_115 = arith.constant dense<0.000000e+00> : vector<2x8xf32>
    %331 = vector.multi_reduction <add>, %330, %cst_115 [2] : vector<2x8x128xf32> to vector<2x8xf32>
    %332 = math.log1p %331 : vector<2x8xf32>
    %cst_116 = arith.constant dense<0.000000e+00> : vector<2xf32>
    %333 = vector.multi_reduction <add>, %332, %cst_116 [1] : vector<2x8xf32> to vector<2xf32>
    %334 = vector.shape_cast %333 : vector<2xf32> to vector<2x1xf32>
    %c20 = arith.constant 20 : index
    %c0_117 = arith.constant 0 : index
    %335 = vector.load %arg3[%c20, %c0_117] : memref<21x10xf32, #tpu.memory_space<vmem>>, vector<1x10xf32>
    %336 = vector.broadcast %334 : vector<2x1xf32> to vector<2x10xf32>
    %337 = vector.broadcast %335 : vector<1x10xf32> to vector<2x10xf32>
    %338 = arith.mulf %336, %337 : vector<2x10xf32>
    %339 = arith.addf %324, %338 : vector<2x10xf32>
    %c0_118 = arith.constant 0 : index
    %c0_119 = arith.constant 0 : index
    %340 = vector.load %arg4[%c0_118, %c0_119] : memref<1x10xf32, #tpu.memory_space<vmem>>, vector<1x10xf32>
    %341 = vector.broadcast %340 : vector<1x10xf32> to vector<2x10xf32>
    %342 = arith.addf %339, %341 : vector<2x10xf32>
    %cst_120 = arith.constant 0.000000e+00 : f32
    %343 = vector.broadcast %cst_120 : f32 to vector<2x10xf32>
    %344 = arith.maximumf %342, %343 : vector<2x10xf32>
    %c0_121 = arith.constant 0 : index
    %c0_122 = arith.constant 0 : index
    %345 = vector.load %arg5[%c0_121, %c0_122] : memref<10x5xf32, #tpu.memory_space<vmem>>, vector<10x5xf32>
    %cst_123 = arith.constant dense<0.000000e+00> : vector<2x5xf32>
    %346 = tpu.matmul %344, %345, %cst_123 {dimension_numbers = #tpu.dot_dimension_numbers<[1], [0], [0], [1], [0, 0, 1, 1], [], []>, precision = #tpu.contract_precision<fp32>} : vector<2x10xf32>, vector<10x5xf32>, vector<2x5xf32> -> vector<2x5xf32>
    %c0_124 = arith.constant 0 : index
    %c0_125 = arith.constant 0 : index
    %347 = vector.load %arg6[%c0_124, %c0_125] : memref<1x5xf32, #tpu.memory_space<vmem>>, vector<1x5xf32>
    %348 = vector.broadcast %347 : vector<1x5xf32> to vector<2x5xf32>
    %349 = arith.addf %346, %348 : vector<2x5xf32>
    %cst_126 = arith.constant 0.000000e+00 : f32
    %350 = vector.broadcast %cst_126 : f32 to vector<2x5xf32>
    %351 = arith.maximumf %349, %350 : vector<2x5xf32>
    %c0_127 = arith.constant 0 : index
    %c0_128 = arith.constant 0 : index
    %352 = vector.load %arg7[%c0_127, %c0_128] : memref<5x1xf32, #tpu.memory_space<vmem>>, vector<5x1xf32>
    %cst_129 = arith.constant dense<0.000000e+00> : vector<2x1xf32>
    %353 = tpu.matmul %351, %352, %cst_129 {dimension_numbers = #tpu.dot_dimension_numbers<[1], [0], [0], [1], [0, 0, 1, 1], [], []>, precision = #tpu.contract_precision<fp32>} : vector<2x5xf32>, vector<5x1xf32>, vector<2x1xf32> -> vector<2x1xf32>
    %c0_130 = arith.constant 0 : index
    %c0_131 = arith.constant 0 : index
    %354 = vector.load %arg8[%c0_130, %c0_131] : memref<1x1xf32, #tpu.memory_space<vmem>>, vector<1x1xf32>
    %355 = vector.broadcast %354 : vector<1x1xf32> to vector<2x1xf32>
    %356 = arith.addf %353, %355 : vector<2x1xf32>
    %c0_132 = arith.constant 0 : index
    %c0_133 = arith.constant 0 : index
    %c0_134 = arith.constant 0 : index
    %357 = vector.load %arg9[%c0_132, %c0_133, %c0_134] : memref<1x2x1xf32, #tpu.memory_space<vmem>>, vector<1x2x1xf32>
    %358 = vector.shape_cast %357 : vector<1x2x1xf32> to vector<2x1xf32>
    %359 = vector.shape_cast %356 : vector<2x1xf32> to vector<1x2x1xf32>
    tpu.vector_store %arg9[%c0_132, %c0_133, %c0_134], %359 {strides = array<i32>} : memref<1x2x1xf32, #tpu.memory_space<vmem>>, vector<1x2x1xf32>,
    return
  }
  func.func @transform_0(%arg0: i32) -> (i32, i32, i32, i32) {
    %c0_i32 = arith.constant 0 : i32
    %c0_i32_0 = arith.constant 0 : i32
    %c0_i32_1 = arith.constant 0 : i32
    %c0_i32_2 = arith.constant 0 : i32
    return %arg0, %c0_i32, %c0_i32_0, %c0_i32_1 : i32, i32, i32, i32
  }
  func.func @transform_1(%arg0: i32) -> (i32, i32, i32, i32) {
    %c0_i32 = arith.constant 0 : i32
    %c0_i32_0 = arith.constant 0 : i32
    %c0_i32_1 = arith.constant 0 : i32
    %c0_i32_2 = arith.constant 0 : i32
    return %arg0, %c0_i32, %c0_i32_0, %c0_i32_1 : i32, i32, i32, i32
  }
  func.func @transform_2(%arg0: i32) -> (i32, i32) {
    %c0_i32 = arith.constant 0 : i32
    %c0_i32_0 = arith.constant 0 : i32
    %c0_i32_1 = arith.constant 0 : i32
    return %c0_i32, %c0_i32_0 : i32, i32
  }
  func.func @transform_3(%arg0: i32) -> (i32, i32) {
    %c0_i32 = arith.constant 0 : i32
    %c0_i32_0 = arith.constant 0 : i32
    %c0_i32_1 = arith.constant 0 : i32
    return %c0_i32, %c0_i32_0 : i32, i32
  }
  func.func @transform_4(%arg0: i32) -> (i32, i32) {
    %c0_i32 = arith.constant 0 : i32
    %c0_i32_0 = arith.constant 0 : i32
    %c0_i32_1 = arith.constant 0 : i32
    return %c0_i32, %c0_i32_0 : i32, i32
  }
  func.func @transform_5(%arg0: i32) -> (i32, i32) {
    %c0_i32 = arith.constant 0 : i32
    %c0_i32_0 = arith.constant 0 : i32
    %c0_i32_1 = arith.constant 0 : i32
    return %c0_i32, %c0_i32_0 : i32, i32
  }
  func.func @transform_6(%arg0: i32) -> (i32, i32) {
    %c0_i32 = arith.constant 0 : i32
    %c0_i32_0 = arith.constant 0 : i32
    %c0_i32_1 = arith.constant 0 : i32
    return %c0_i32, %c0_i32_0 : i32, i32
  }
  func.func @transform_7(%arg0: i32) -> (i32, i32) {
    %c0_i32 = arith.constant 0 : i32
    %c0_i32_0 = arith.constant 0 : i32
    %c0_i32_1 = arith.constant 0 : i32
    return %c0_i32, %c0_i32_0 : i32, i32
  }
  func.func @transform_8(%arg0: i32) -> (i32, i32, i32) {
    %c0_i32 = arith.constant 0 : i32
    %c0_i32_0 = arith.constant 0 : i32
    %c0_i32_1 = arith.constant 0 : i32
    return %arg0, %c0_i32, %c0_i32_0 : i32, i32, i32
  }
}

</mosaic_0001>

<bundles_post_ra>
// kernel: tpu_custom_call.1
= control target key start
LH: loop header
LB: loop body
LE: loop exit
PB: predicated region body
PF: predicated region fallthrough
CT: control target
= control target key end

     0   :  { %s5550_s0 = inlined_call_operand.vmem [shape: f32[2,2,8,32], index: 0, kind: input, shape index: {}]   ;;  %s5551_s1 = inlined_call_operand.hbm [shape: f32[2,2,32,128], index: 1, kind: input, shape index: {}]   ;;  %s5552_s2 = inlined_call_operand.vmem [shape: f32[21,10], index: 2, kind: input, shape index: {}]   ;;  %s5553_s3 = inlined_call_operand.vmem [shape: f32[1,10], index: 3, kind: input, shape index: {}]   ;;  %s5554_s4 = inlined_call_operand.vmem [shape: f32[10,5], index: 4, kind: input, shape index: {}]   ;;  %s5555_s5 = inlined_call_operand.vmem [shape: f32[1,5], index: 5, kind: input, shape index: {}]   ;;  %s5556_s6 = inlined_call_operand.vmem [shape: f32[5,1], index: 6, kind: input, shape index: {}]   ;;  %s5557_s7 = inlined_call_operand.<no memory space> [shape: f32[1,1], index: 7, kind: input, shape index: {}]   ;;  %s5558_s8 = inlined_call_operand.vmem [shape: f32[2,2,1], index: 8, kind: output, shape index: {}]  }
   0x1   :  { %v13_v0 = vstv %s5557_s7 }
   0x2   :  { %14 = vst [vmem:[#allocation2] sm:$0x1] %v13_v0 }
   0x3   :  { %15 = vsyncpa [#allocation4], 0 }
   0x4   :  { %17 = vsyncpa [#allocation4 + $0x1], 0  ;;  %s4299_s29 = smov 0   ;;  %s4301_s30 = smov 0  }
   0x5   :  { %s4303_s9 = smov 0   ;;  %s4305_s10 = smov 0  }
   0x6 LB: > { %s4318_s7 = sadd.s32 4294967295, %s4244_s10   ;;  %s4321_s11 = sadd.s32 1, %s4244_s10   ;;  %s4244_s10 = sphi %s4305_s10, %s5658_s10   ;;  %s4240_s9 = sphi %s4303_s9, %s5657_s9   ;;  %s4236_s30 = sphi %s4301_s30, %s5656_s30   ;;  %s4232_s29 = sphi %s4299_s29, %s5655_s29  }
   0x7   : > { %s53_s12 = ssub.s32 %s4244_s10, %s4321_s11  ;;  %s56_s13 = sadd.s32 1, %s4240_s9 }
   0x8   : > { %p54_p0 = scmp.eq.s32.totalorder %s53_s12, 0  ;;  %p63_p1 = scmp.ne.s32.totalorder %s4240_s9, %s4236_s30 }
   0x9   : > { %p64_p2 = scmp.eq.s32.totalorder %s4244_s10, 0  ;;  %p69_p3 = scmp.ne.s32.totalorder %s4236_s30, %s4232_s29 }
   0xa   : > { %s4331_s14 = scalar_select %p54_p0, %s4240_s9, %s56_s13  }
   0xb   : > { %p65_p4 = por %p64_p2, %p63_p1  ;;  %p70_p5 = scmp.eq.s32.totalorder %s4318_s7, 0 }
   0xc   : > { %p3961_p6 = scmp.lt.s32.totalorder %s4244_s10, 2  ;;  %s271_s16 = sand.u32 1, %s4240_s9  }
   0xd   : > { %p4335_p7 = por %p70_p5, %p69_p3  ;;  %s3583_s17 = sshll.u32 %s271_s16, 6 }
   0xe   : > { %s3659_s18 = sshll.u32 %s4244_s10, 10  ;;  %s275_s22 = scalar_lea.vmem [#allocation3], %s3583_s17 }
   0xf   : > { %s5562_s15 = scalar_select %p4335_p7, 1, 0 }
  0x10   : > { %s4344_s21 = scalar_lea.hbm %s5551_s1, %s3659_s18  ;;  %s282_s23 = sshll.u32 %s275_s22, 4  ;;  %s4346_s23 = int_to_ptr.vmem [resolvable:$true] %s282_s23 }
  0x11   : > { %p4348_p8 = pnand %p3961_p6, %p65_p4  ;;  %s4353_s25 = scalar_lea.sflag [#allocation4], %s271_s16 }
  0x12   : > { %s4182_s26 = scalar_lea.hbm %s4344_s21, 1024  ;;  %s4187_s29 = scalar_lea.hbm %s5551_s1, 2048 }
  0x13   : > { %p4183_p10 = scmp.ne.s32.totalorder %s4344_s21, %s4182_s26  ;;  %p4184_p11 = pneg %p4348_p8 }
  0x14   : > { %p4188_p0 = scmp.lt.s32.totalorder %s4344_s21, %s5551_s1  ;;  %p4189_p1 = scmp.lt.s32.totalorder %s4187_s29, %s4182_s26 }
  0x15   : > { %p4185_p12 = pnand %p4184_p11, %p4183_p10 }
  0x16   : > { %p4190_p2 = por %p4189_p1, %p4188_p0 }
  0x17   : > { %p4186_p13 = pneg %p4185_p12 }
  0x19   : > { %p4191_p3 = pnand %p4190_p2, %p4186_p13 }
  0x1b   : > { %4194 = shalt.err (!%p4191_p3)
}
  0x1c   : > { %s4195_s16 = scalar_lea.vmem %s4346_s23, 1024  ;;  %s4246_s17 = smov [#allocation3]  }
  0x1d   : > { %p4196_p4 = scmp.ne.s32.totalorder %s4346_s23, %s4195_s16  ;;  %s4200_s18 = sshll.u32 %s4246_s17, 4  ;;  %s4201_s18 = int_to_ptr.vmem [resolvable:$false] %s4200_s18 }
  0x1e   : > { %s4202_s19 = scalar_lea.vmem %s4201_s18, 2048  ;;  %p4203_p10 = scmp.lt.s32.totalorder %s4346_s23, %s4201_s18 }
  0x1f   : > { %p4198_p5 = pnand %p4196_p4, %p4184_p11  ;;  %p4204_p12 = scmp.lt.s32.totalorder %s4202_s19, %s4195_s16 }
  0x21   : > { %p4199_p6 = pneg %p4198_p5  ;;  %p4205_p9 = por %p4204_p12, %p4203_p10 }
  0x23   : > { %p4206_p7 = pnand %p4205_p9, %p4199_p6 }
  0x25   : > { %4209 = shalt.err (!%p4206_p7)
}
  0x26   : > { %s4247_s20 = smov 128   ;;  %s4248_s22 = smov 8  }
  0x27   : > { %3960 = dma.hbm_to_vmem [thread:$0]  (!%p4348_p8), %s4344_s21, 1024, %s4346_s23, %s4353_s25, %s4247_s20, %s4247_s20, %s4248_s22  }
  0x28   : > { %p290_p11 = scmp.lt.s32.totalorder %s4244_s10, 3  ;;  %p5564_p13 = scmp.ge.s32.totalorder %s4244_s10, 1 }
  0x2a   : > { %p291_p0 = pnand %p5564_p13, %p290_p11 }
  0x2c   : > { %294 = sbr.rel (%p291_p0) target bundleno = 1340 (0x53c), region = 52 }
  0x31   : > { %s296_s26 = sand.u32 1, %s4236_s30   ;;  %p5565_p7 = scmp.ne.s32.totalorder %s5562_s15, 0 }
  0x32   : > { %s3587_s27 = sshll.u32 %s296_s26, 6  ;;  %s297_s28 = scalar_lea.sflag [#allocation4], %s296_s26 }
  0x33   : > { %s4378_s29 = scalar_lea.vmem [#allocation3], %s3587_s27 }
  0x34   : > { %4227 = dma.done.wait (%p5565_p7), %s297_s28, 1024  }
  0x35   : > { %4229 = vsyncadd (%p5565_p7), %s297_s28, 4294966272  ;;  %p337_p8 = scmp.lt.s32.totalorder %s4318_s7, 1  ;;  %vm358_vm0 = vcmask 261120   ;;  %v348_v3 = vld [vmem:[%s4378_s29] sm:$0xff]  ;;  %v349_v6 = vld [vmem:[%s4378_s29 + $0x8] sm:$0xff]  ;;  %v5560_v28 = vmov 0.0  }
  0x36   : > { %v350_v7 = vld [vmem:[%s4378_s29 + $0x10] sm:$0xff]  ;;  %v351_v8 = vld [vmem:[%s4378_s29 + $0x18] sm:$0xff]  ;;  %v385_v9 = vmul.f32 %v348_v3, %v348_v3  ;;  %v386_v10 = vmul.f32 %v349_v6, %v349_v6  ;;  %3762 = vmatprep.subr.mxu1 %v5560_v28  ;;  %3751 = vmatprep.subr.mxu0 %v5560_v28  ;;  %vm4250_vm3 = vmmov 0   ;;  %v4461_v56 = vld [vmem:[%s4378_s29 + $0x20] sm:$0xff] }
  0x37   : > { %s5660_s7 = smov (!%p337_p8, %s4318_s7), 1  ;;  %v387_v11 = vmul.f32 %v350_v7, %v350_v7  ;;  %v388_v13 = vmul.f32 %v351_v8, %v351_v8  ;;  %3770 = vmatprep.mubr.msk.f32.mxu1 %vm4250_vm3, %v5560_v28  ;;  %3759 = vmatprep.mubr.msk.f32.mxu0 %vm4250_vm3, %v5560_v28  ;;  %v353_v57 = vld [vmem:[%s4378_s29 + $0x28] sm:$0xff]  ;;  %v389_v58 = vmul.f32 %v4461_v56, %v4461_v56  ;;  %v354_v60 = vld [vmem:[%s4378_s29 + $0x30] sm:$0xff]  ;;  %v355_v63 = vld [vmem:[%s4378_s29 + $0x38] sm:$0xff] }
  0x38   : > { %s3660_s10 = sshll.u32 %s5660_s7, 4  ;;  %v393_v14 = vadd.f32 %v386_v10, %v385_v9  ;;  %v390_v59 = vmul.f32 %v353_v57, %v353_v57  ;;  %v391_v61 = vmul.f32 %v354_v60, %v354_v60  ;;  %v392_v0 = vmul.f32 %v355_v63, %v355_v63  ;;  %s3590_s23 = sshll.u32 %s5660_s7, 1 }
  0x39   : > { %s341_s24 = scalar_lea.vmem %s5550_s0, %s3660_s10  ;;  %s345_s25 = scalar_lea.vmem %s5558_s8, %s3590_s23 }
  0x3a   : > { %v4392_v1 = vld [vmem:[%s341_s24] sm:$0xff]  ;;  %v4394_v2 = vld [vmem:[%s341_s24 + $0x8] sm:$0xff]  ;;  %v394_v16 = vadd.f32 %v393_v14, %v387_v11  ;;  %v402_v62 = vadd.f32 %v390_v59, %v389_v58 }
  0x3b   : > { %v356_v4 = vmul.f32 %v4392_v1, %v4392_v1  ;;  %v357_v5 = vmul.f32 %v4394_v2, %v4394_v2 }
  0x3c   : > { %v395_v17 = vadd.f32 %v394_v16, %v388_v13 }
  0x3d   : > { %v359_v12 = vsel %vm358_vm0, %v356_v4, 0.0  ;;  %v362_v15 = vsel %vm358_vm0, %v357_v5, 0.0 }
  0x3e   : > { %360 = vadd.xlane.f32.xlu0 %v359_v12  ;;  %v396_v18 = vrot.slane %v395_v17, 4 }
  0x40   : > { %v397_v19 = vadd.f32 %v396_v18, %v395_v17 }
  0x42   : > { %363 = vadd.xlane.f32.xlu0 %v362_v15  ;;  %v398_v20 = vrot.slane %v397_v19, 2 }
  0x44   : > { %v399_v21 = vadd.f32 %v398_v20, %v397_v19 }
  0x46   : > { %v400_v22 = vrot.slane %v399_v21, 1 }
  0x48   : > { %v401_v23 = vadd.f32 %v400_v22, %v399_v21 }
  0x4a   : > { %3998 = vrsqrt.f32 %v401_v23  ;;  %vm413_vm1 = vcmp.eq.f32.partialorder %v401_v23, inf  ;;  %v416_v25 = vand.u32 2147483648, %v401_v23  ;;  %vm415_vm2 = vcmp.eq.f32.partialorder %v401_v23, 0.0 }
  0x57   : > { %v3999_v24 = vpop.eup %3998 }
  0x58   : > { %v412_v26 = vmul.f32 %v3999_v24, %v401_v23 }
  0x5a   : > { %v414_v27 = vsel %vm413_vm1, %v401_v23, %v412_v26  ;;  %vm1460_vm1 = vcmask 1041409  }
  0x5b   : > { %v417_v29 = vsel %vm415_vm2, %v416_v25, %v414_v27  ;;  %vm1463_vm2 = vcmask 58368  }
  0x5c   : > { %v425_v30 = vmax.f32 %v417_v29, 1e-12 }
  0x5e   : > { %4000 = vrcp.f32 %v425_v30 }
  0x6b   : > { %v4001_v31 = vpop.eup %4000 }
  0x6c   : > { %v431_v32 = vmul.f32 %v4001_v31, %v351_v8  ;;  %v430_v33 = vmul.f32 %v4001_v31, %v350_v7  ;;  %v429_v34 = vmul.f32 %v4001_v31, %v349_v6  ;;  %v428_v35 = vmul.f32 %v4001_v31, %v348_v3 }
  0x6d   : > { %v403_v3 = vadd.f32 %v402_v62, %v391_v61 }
  0x6e   : > { %v4412_v36 = vand.u32 4294901760, %v431_v32  ;;  %v4414_v37 = vand.u32 4294901760, %v430_v33  ;;  %v4416_v38 = vand.u32 4294901760, %v429_v34  ;;  %v4418_v39 = vand.u32 4294901760, %v428_v35 }
  0x6f   : > { %v404_v4 = vadd.f32 %v403_v3, %v392_v0 }
  0x70   : > { %v4421_v40 = vsub.f32 %v431_v32, %v4412_v36  ;;  %v4424_v41 = vsub.f32 %v430_v33, %v4414_v37  ;;  %v4427_v42 = vsub.f32 %v429_v34, %v4416_v38  ;;  %v4430_v43 = vsub.f32 %v428_v35, %v4418_v39  ;;  %3752 = vmatpush3.msra.mxu0 %v4412_v36 }
  0x71   : > { %3753 = vmatprep.subr.mxu0 %v5560_v28  ;;  %v405_v5 = vrot.slane %v404_v4, 4 }
  0x72   : > { %v546_v44 = vand.u32 4294901760, %v4421_v40  ;;  %v553_v45 = vand.u32 4294901760, %v4424_v41  ;;  %v560_v46 = vand.u32 4294901760, %v4427_v42  ;;  %v567_v47 = vand.u32 4294901760, %v4430_v43  ;;  %3754 = vmatpush3.msra.mxu0 %v4414_v37 }
  0x73   : > { %3755 = vmatprep.subr.mxu0 %v5560_v28  ;;  %v406_v6 = vadd.f32 %v405_v5, %v404_v4 }
  0x74   : > { %v547_v48 = vsub.f32 %v4421_v40, %v546_v44  ;;  %v554_v49 = vsub.f32 %v4424_v41, %v553_v45  ;;  %v561_v50 = vsub.f32 %v4427_v42, %v560_v46  ;;  %3756 = vmatpush3.msra.mxu0 %v4416_v38  ;;  %v568_v53 = vsub.f32 %v4430_v43, %v567_v47 }
  0x75   : > { %3757 = vmatprep.subr.mxu0 %v5560_v28  ;;  %v407_v7 = vrot.slane %v406_v6, 2 }
  0x76   : > { %v548_v51 = vand.u32 4294901760, %v547_v48  ;;  %v555_v52 = vand.u32 4294901760, %v554_v49  ;;  %3758 = vmatpush3.msra.mxu0 %v4418_v39  ;;  %v562_v54 = vand.u32 4294901760, %v561_v50  ;;  %v569_v55 = vand.u32 4294901760, %v568_v53 }
  0x77   : > { %3773 = vmatprep.subr.mxu0 %v5560_v28  ;;  %v408_v8 = vadd.f32 %v407_v7, %v406_v6 }
  0x78   : > { %3763 = vmatpush3.msra.mxu1 %v548_v51 }
  0x79   : > { %3764 = vmatprep.subr.mxu1 %v5560_v28  ;;  %v409_v9 = vrot.slane %v408_v8, 1 }
  0x7a   : > { %3765 = vmatpush3.msra.mxu1 %v555_v52 }
  0x7b   : > { %3766 = vmatprep.subr.mxu1 %v5560_v28  ;;  %v410_v10 = vadd.f32 %v409_v9, %v408_v8 }
  0x7c   : > { %3767 = vmatpush3.msra.mxu1 %v562_v54 }
  0x7d   : > { %3768 = vmatprep.subr.mxu1 %v5560_v28  ;;  %4002 = vrsqrt.f32 %v410_v10  ;;  %vm420_vm4 = vcmp.eq.f32.partialorder %v410_v10, inf  ;;  %v423_v15 = vand.u32 2147483648, %v410_v10  ;;  %vm422_vm5 = vcmp.eq.f32.partialorder %v410_v10, 0.0 }
  0x7e   : > { %3769 = vmatpush3.msra.mxu1 %v569_v55 }
  0x7f   : > { %3784 = vmatprep.subr.mxu1 %v5560_v28 }
  0x8a   : > { %v4003_v12 = vpop.eup %4002 }
  0x8b   : > { %v419_v14 = vmul.f32 %v4003_v12, %v410_v10 }
  0x8d   : > { %v421_v16 = vsel %vm420_vm4, %v410_v10, %v419_v14 }
  0x8e   : > { %v424_v17 = vsel %vm422_vm5, %v423_v15, %v421_v16 }
  0x8f   : > { %v426_v21 = vmax.f32 %v424_v17, 1e-12 }
  0xc7   : > { %v361_v11 = vpop.xlane.xlu0 %360 }
  0xc8   : > { %4004 = vrsqrt.f32 %v361_v11  ;;  %vm367_vm6 = vcmp.eq.f32.partialorder %v361_v11, inf  ;;  %v370_v20 = vand.u32 2147483648, %v361_v11  ;;  %vm369_vm7 = vcmp.eq.f32.partialorder %v361_v11, 0.0 }
  0xcb   : > { %v364_v13 = vpop.xlane.xlu0 %363 }
  0xcc   : > { %4006 = vrsqrt.f32 %v364_v13  ;;  %vm374_vm8 = vcmp.eq.f32.partialorder %v364_v13, inf  ;;  %v377_v27 = vand.u32 2147483648, %v364_v13  ;;  %vm376_vm9 = vcmp.eq.f32.partialorder %v364_v13, 0.0 }
  0xcd   : > { %4008 = vrcp.f32 %v426_v21 }
  0xd5   : > { %v4005_v18 = vpop.eup %4004 }
  0xd6   : > { %v366_v19 = vmul.f32 %v4005_v18, %v361_v11 }
  0xd8   : > { %v368_v22 = vsel %vm367_vm6, %v361_v11, %v366_v19 }
  0xd9   : > { %v371_v23 = vsel %vm369_vm7, %v370_v20, %v368_v22  ;;  %v4007_v24 = vpop.eup %4006 }
  0xda   : > { %v379_v25 = vmax.f32 %v371_v23, 1e-12  ;;  %v373_v26 = vmul.f32 %v4007_v24, %v364_v13  ;;  %v4009_v32 = vpop.eup %4008 }
  0xdb   : > { %v436_v35 = vmul.f32 %v4009_v32, %v355_v63  ;;  %v435_v50 = vmul.f32 %v4009_v32, %v354_v60  ;;  %v434_v53 = vmul.f32 %v4009_v32, %v353_v57  ;;  %v433_v55 = vmul.f32 %v4009_v32, %v4461_v56 }
  0xdc   : > { %4010 = vrcp.f32 %v379_v25  ;;  %v375_v29 = vsel %vm374_vm8, %v364_v13, %v373_v26 }
  0xdd   : > { %v378_v30 = vsel %vm376_vm9, %v377_v27, %v375_v29  ;;  %v4474_v52 = vand.u32 4294901760, %v436_v35  ;;  %v4480_v54 = vand.u32 4294901760, %v435_v50  ;;  %v4488_v57 = vand.u32 4294901760, %v434_v53 }
  0xde   : > { %v380_v31 = vmax.f32 %v378_v30, 1e-12  ;;  %v4495_v62 = vand.u32 4294901760, %v433_v55 }
  0xdf   : > { %v4486_v59 = vsub.f32 %v436_v35, %v4474_v52  ;;  %v4493_v61 = vsub.f32 %v435_v50, %v4480_v54  ;;  %v4501_v63 = vsub.f32 %v434_v53, %v4488_v57 }
  0xe0   : > { %4012 = vrcp.f32 %v380_v31  ;;  %v4508_v4 = vsub.f32 %v433_v55, %v4495_v62 }
  0xe1   : > { %v1034_v56 = vand.u32 4294901760, %v4486_v59  ;;  %v1041_v3 = vand.u32 4294901760, %v4493_v61  ;;  %v1048_v5 = vand.u32 4294901760, %v4501_v63 }
  0xe2   : > { %v1055_v7 = vand.u32 4294901760, %v4508_v4 }
  0xe9   : > { %v4011_v33 = vpop.eup %4010 }
  0xea   : > { %v382_v34 = vmul.f32 %v4011_v33, %v4392_v1 }
  0xec   : > { %v438_v48 = vsel %vm358_vm0, %v382_v34, 0 }
  0xed   : > { %v4470_v49 = vand.u32 4294901760, %v438_v48  ;;  %v4013_v0 = vpop.eup %4012 }
  0xee   : > { %v384_v6 = vmul.f32 %v4013_v0, %v4394_v2 }
  0xef   : > { %v510_v51 = vsub.f32 %v438_v48, %v4470_v49  ;;  %3771 = vmatmul.mubr.f32.vlgmr.msra.gmra.mxu1 %v4470_v49 }
  0xf0   : > { %3785 = vmatpush3.msra.mxu1 %v4412_v36  ;;  %3792 = vmatprep.mubr.msk.f32.mxu1 %vm4250_vm3, %v5560_v28  ;;  %v926_v8 = vsel %vm358_vm0, %v384_v6, 0 }
  0xf1   : > { %3786 = vmatprep.subr.mxu1 %v5560_v28  ;;  %v511_v1 = vand.u32 4294901760, %v510_v51  ;;  %v4546_v10 = vand.u32 4294901760, %v926_v8 }
  0xf2   : > { %3787 = vmatpush3.msra.mxu1 %v4414_v37 }
  0xf3   : > { %3788 = vmatprep.subr.mxu1 %v5560_v28  ;;  %v512_v58 = vsub.f32 %v510_v51, %v511_v1 }
  0xf4   : > { %3789 = vmatpush3.msra.mxu1 %v4416_v38 }
  0xf5   : > { %3790 = vmatprep.subr.mxu1 %v5560_v28  ;;  %v513_v60 = vand.u32 4294901760, %v512_v58 }
  0xf6   : > { %3791 = vmatpush3.msra.mxu1 %v4418_v39 }
  0xf7   : > { %3793 = vmatmul.mubr.f32.vlgmr.msra.gmra.mxu1 %v511_v1  ;;  %3806 = vmatprep.subr.mxu1 %v5560_v28 }
  0xf8   : > { %3760 = vmatmul.mubr.f32.vlgmr.msra.gmra.mxu0 %v513_v60  ;;  %3807 = vmatpush3.msra.mxu1 %v4412_v36  ;;  %v1035_v36 = vsub.f32 %v4486_v59, %v1034_v56 }
  0xf9   : > { %3774 = vmatpush3.msra.mxu0 %v4421_v40  ;;  %3808 = vmatprep.subr.mxu1 %v5560_v28  ;;  %v998_v40 = vsub.f32 %v926_v8, %v4546_v10 }
  0xfa   : > { %3775 = vmatprep.subr.mxu0 %v5560_v28  ;;  %3809 = vmatpush3.msra.mxu1 %v4414_v37  ;;  %v1042_v37 = vsub.f32 %v4493_v61, %v1041_v3  ;;  %v1036_v2 = vand.u32 4294901760, %v1035_v36 }
  0xfb   : > { %3776 = vmatpush3.msra.mxu0 %v4424_v41  ;;  %3810 = vmatprep.subr.mxu1 %v5560_v28  ;;  %v999_v41 = vand.u32 4294901760, %v998_v40 }
  0xfc   : > { %3777 = vmatprep.subr.mxu0 %v5560_v28  ;;  %3811 = vmatpush3.msra.mxu1 %v4416_v38  ;;  %v1049_v38 = vsub.f32 %v4501_v63, %v1048_v5  ;;  %v1043_v9 = vand.u32 4294901760, %v1042_v37 }
  0xfd   : > { %3778 = vmatpush3.msra.mxu0 %v4427_v42  ;;  %3812 = vmatprep.subr.mxu1 %v5560_v28  ;;  %v1000_v42 = vsub.f32 %v998_v40, %v999_v41 }
  0xfe   : > { %3779 = vmatprep.subr.mxu0 %v5560_v28  ;;  %3781 = vmatprep.mubr.msk.f32.mxu0 %vm4250_vm3, %v5560_v28  ;;  %v1050_v11 = vand.u32 4294901760, %v1049_v38 }
  0xff   : > { %3780 = vmatpush3.msra.mxu0 %v4430_v43  ;;  %3813 = vmatpush3.msra.mxu1 %v4418_v39  ;;  %v1056_v39 = vsub.f32 %v4508_v4, %v1055_v7  ;;  %v1001_v43 = vand.u32 4294901760, %v1000_v42 }
 0x100   : > { %3814 = vmatprep.mubr.msk.f32.mxu1 %vm4250_vm3, %v5560_v28  ;;  %3782 = vmatmul.mubr.f32.vlgmr.msra.gmra.mxu0 %v510_v51 }
 0x101   : > { %3795 = vmatprep.subr.mxu0 %v5560_v28  ;;  %3815 = vmatmul.mubr.f32.vlgmr.msra.gmra.mxu1 %v4470_v49  ;;  %v1057_v12 = vand.u32 4294901760, %v1056_v39 }
 0x102   : > { %3828 = vmatprep.subr.mxu1 %v5560_v28  ;;  %3796 = vmatpush3.msra.mxu0 %v546_v44  ;;  %v1413_v44 = vlaneseq }
 0x103   : > { %3829 = vmatpush3.msra.mxu1 %v1036_v2  ;;  %3797 = vmatprep.subr.mxu0 %v5560_v28 }
 0x104   : > { %3830 = vmatprep.subr.mxu1 %v5560_v28  ;;  %3798 = vmatpush3.msra.mxu0 %v553_v45  ;;  %v4629_v45 = vand.u32 127, %v1413_v44 }
 0x105   : > { %3831 = vmatpush3.msra.mxu1 %v1043_v9  ;;  %3799 = vmatprep.subr.mxu0 %v5560_v28 }
 0x106   : > { %3832 = vmatprep.subr.mxu1 %v5560_v28  ;;  %3800 = vmatpush3.msra.mxu0 %v560_v46  ;;  %v1453_v46 = vshrl.u32 %v1413_v44, 7  ;;  %vm1415_vm10 = vcmp.lt.s32.totalorder %v4629_v45, 12 }
 0x107   : > { %3833 = vmatpush3.msra.mxu1 %v1050_v11  ;;  %3801 = vmatprep.subr.mxu0 %v5560_v28 }
 0x108   : > { %3834 = vmatprep.subr.mxu1 %v5560_v28  ;;  %3802 = vmatpush3.msra.mxu0 %v567_v47  ;;  %v4632_v47 = vsub.s32 %v4629_v45, %v1453_v46 }
 0x109   : > { %3803 = vmatprep.mubr.msk.f32.mxu0 %vm4250_vm3, %v5560_v28  ;;  %3835 = vmatpush3.msra.mxu1 %v1057_v12 }
 0x10a   : > { %3836 = vmatprep.mubr.msk.f32.mxu1 %vm4250_vm3, %v5560_v28  ;;  %3804 = vmatmul.mubr.f32.vlgmr.msra.gmra.mxu0 %v4470_v49 }
 0x10b   : > { %3817 = vmatprep.subr.mxu0 %v5560_v28  ;;  %3837 = vmatmul.mubr.f32.vlgmr.msra.gmra.mxu1 %v4546_v10 }
 0x10c   : > { %3850 = vmatprep.subr.mxu1 %v5560_v28  ;;  %3818 = vmatpush3.msra.mxu0 %v4474_v52 }
 0x10d   : > { %3851 = vmatpush3.msra.mxu1 %v4474_v52  ;;  %3819 = vmatprep.subr.mxu0 %v5560_v28 }
 0x10e   : > { %3852 = vmatprep.subr.mxu1 %v5560_v28  ;;  %3820 = vmatpush3.msra.mxu0 %v4480_v54 }
 0x10f   : > { %3853 = vmatpush3.msra.mxu1 %v4480_v54  ;;  %3821 = vmatprep.subr.mxu0 %v5560_v28 }
 0x110   : > { %3854 = vmatprep.subr.mxu1 %v5560_v28  ;;  %3822 = vmatpush3.msra.mxu0 %v4488_v57 }
 0x111   : > { %3855 = vmatpush3.msra.mxu1 %v4488_v57  ;;  %3823 = vmatprep.subr.mxu0 %v5560_v28 }
 0x112   : > { %3856 = vmatprep.subr.mxu1 %v5560_v28  ;;  %3824 = vmatpush3.msra.mxu0 %v4495_v62 }
 0x113   : > { %3825 = vmatprep.mubr.msk.f32.mxu0 %vm4250_vm3, %v5560_v28  ;;  %3857 = vmatpush3.msra.mxu1 %v4495_v62 }
 0x114   : > { %3858 = vmatprep.mubr.msk.f32.mxu1 %vm4250_vm3, %v5560_v28  ;;  %3826 = vmatmul.mubr.f32.vlgmr.msra.gmra.mxu0 %v1001_v43 }
 0x115   : > { %3839 = vmatprep.subr.mxu0 %v5560_v28  ;;  %3859 = vmatmul.mubr.f32.vlgmr.msra.gmra.mxu1 %v999_v41 }
 0x116   : > { %3872 = vmatprep.subr.mxu1 %v5560_v28  ;;  %3840 = vmatpush3.msra.mxu0 %v4486_v59 }
 0x117   : > { %3873 = vmatpush3.msra.mxu1 %v4474_v52  ;;  %3841 = vmatprep.subr.mxu0 %v5560_v28 }
 0x118   : > { %3874 = vmatprep.subr.mxu1 %v5560_v28  ;;  %3842 = vmatpush3.msra.mxu0 %v4493_v61 }
 0x119   : > { %3875 = vmatpush3.msra.mxu1 %v4480_v54  ;;  %3843 = vmatprep.subr.mxu0 %v5560_v28 }
 0x11a   : > { %3876 = vmatprep.subr.mxu1 %v5560_v28  ;;  %3844 = vmatpush3.msra.mxu0 %v4501_v63 }
 0x11b   : > { %3877 = vmatpush3.msra.mxu1 %v4488_v57  ;;  %3845 = vmatprep.subr.mxu0 %v5560_v28 }
 0x11c   : > { %3878 = vmatprep.subr.mxu1 %v5560_v28  ;;  %3846 = vmatpush3.msra.mxu0 %v4508_v4 }
 0x11d   : > { %3847 = vmatprep.mubr.msk.f32.mxu0 %vm4250_vm3, %v5560_v28  ;;  %3879 = vmatpush3.msra.mxu1 %v4495_v62 }
 0x11e   : > { %3880 = vmatprep.mubr.msk.f32.mxu1 %vm4250_vm3, %v5560_v28  ;;  %3848 = vmatmul.mubr.f32.vlgmr.msra.gmra.mxu0 %v998_v40 }
 0x11f   : > { %3861 = vmatprep.subr.mxu0 %v5560_v28  ;;  %3881 = vmatmul.mubr.f32.vlgmr.msra.gmra.mxu1 %v4546_v10 }
 0x120   : > { %3862 = vmatpush3.msra.mxu0 %v1034_v56  ;;  %3869 = vmatprep.mubr.msk.f32.mxu0 %vm4250_vm3, %v5560_v28 }
 0x121   : > { %3863 = vmatprep.subr.mxu0 %v5560_v28  ;;  %3890 = vmatprep.subr.mxu1 %v5560_v28 }
 0x122   : > { %3864 = vmatpush3.msra.mxu0 %v1041_v3  ;;  %3894 = vmatprep.mubr.msk.f32.mxu1 %vm4250_vm3, %v5560_v28 }
 0x123   : > { %3865 = vmatprep.subr.mxu0 %v5560_v28 }
 0x124   : > { %3866 = vmatpush3.msra.mxu0 %v1048_v5 }
 0x125   : > { %3867 = vmatprep.subr.mxu0 %v5560_v28 }
 0x126   : > { %3868 = vmatpush3.msra.mxu0 %v1055_v7 }
 0x127   : > { %3870 = vmatmul.mubr.f32.vlgmr.msra.gmra.mxu0 %v4546_v10  ;;  %3883 = vmatprep.subr.mxu0 %v5560_v28 }
 0x128   : > { %3887 = vmatprep.mubr.msk.f32.mxu0 %vm4250_vm3, %v5560_v28 }
 0x1af   : > { %v606_v13 = vpop.f32.mrf.mxu1 }
 0x1b1   : > { %v3772_v14 = vpop.f32.mrf.mxu1 }
 0x1b7   : > { %v763_v15 = vpop.f32.mrf.mxu1 }
 0x1b8   : > { %v515_v16 = vpop.f32.mrf.mxu0 }
 0x1b9   : > { %v3794_v17 = vpop.f32.mrf.mxu1  ;;  %v607_v22 = vadd.f32 %v606_v13, %v515_v16 }
 0x1ba   : > { %v3761_v18 = vpop.f32.mrf.mxu0 }
 0x1c0   : > { %v686_v19 = vpop.f32.mrf.mxu0 }
 0x1c1   : > { %v921_v20 = vpop.f32.mrf.mxu1  ;;  %v687_v24 = vadd.f32 %v686_v19, %v607_v22 }
 0x1c2   : > { %v3783_v21 = vpop.f32.mrf.mxu0 }
 0x1c3   : > { %v3816_v23 = vpop.f32.mrf.mxu1  ;;  %v764_v25 = vadd.f32 %v763_v15, %v687_v24 }
 0x1ca   : > { %v846_v26 = vpop.f32.mrf.mxu0 }
 0x1cb   : > { %v847_v27 = vadd.f32 %v846_v26, %v764_v25  ;;  %v1094_v29 = vpop.f32.mrf.mxu1 }
 0x1cc   : > { %v3805_v30 = vpop.f32.mrf.mxu0 }
 0x1cd   : > { %v922_v31 = vadd.f32 %v921_v20, %v847_v27  ;;  %v3838_v32 = vpop.f32.mrf.mxu1 }
 0x1cf   : > { %v4637_v33 = vsel %vm1415_vm10, %v922_v31, 10000.0 }
 0x1d0   : > { %v3594_v34 = vadd.f32 0.85, %v4637_v33  ;;  %v3591_v35 = vadd.f32 0.95, %v4637_v33  ;;  %v3597_v48 = vadd.f32 0.75, %v4637_v33  ;;  %v3612_v8 = vadd.f32 0.25, %v4637_v33 }
 0x1d1   : > { %v3600_v49 = vadd.f32 0.65, %v4637_v33  ;;  %v3603_v53 = vadd.f32 0.55, %v4637_v33  ;;  %v3606_v63 = vadd.f32 0.45, %v4637_v33 }
 0x1d2   : > { %v1475_v50 = vmul.f32 %v3594_v34, %v3594_v34  ;;  %v1420_v51 = vmul.f32 %v3591_v35, %v3591_v35  ;;  %v1529_v52 = vmul.f32 %v3597_v48, %v3597_v48  ;;  %v3609_v36 = vadd.f32 0.35, %v4637_v33 }
 0x1d3   : > { %v1583_v59 = vmul.f32 %v3600_v49, %v3600_v49  ;;  %v1637_v4 = vmul.f32 %v3603_v53, %v3603_v53  ;;  %v1691_v37 = vmul.f32 %v3606_v63, %v3606_v63  ;;  %v1799_v41 = vmul.f32 %v3612_v8, %v3612_v8 }
 0x1d4   : > { %v1003_v1 = vpop.f32.mrf.mxu0  ;;  %v1477_v54 = vmul.f32 -50.0, %v1475_v50  ;;  %v1422_v55 = vmul.f32 -50.0, %v1420_v51  ;;  %v1531_v58 = vmul.f32 -50.0, %v1529_v52  ;;  %v1745_v38 = vmul.f32 %v3609_v36, %v3609_v36 }
 0x1d5   : > { %v1251_v57 = vpop.f32.mrf.mxu1  ;;  %v1585_v3 = vmul.f32 -50.0, %v1583_v59  ;;  %v1639_v6 = vmul.f32 -50.0, %v1637_v4  ;;  %v1095_v9 = vadd.f32 %v1094_v29, %v1003_v1  ;;  %v1693_v11 = vmul.f32 -50.0, %v1691_v37 }
 0x1d6   : > { %v3827_v60 = vpop.f32.mrf.mxu0  ;;  %v1479_v61 = vmul.f32 1.442695, %v1477_v54  ;;  %v1424_v62 = vmul.f32 1.442695, %v1422_v55  ;;  %v1533_v0 = vmul.f32 1.442695, %v1531_v58 }
 0x1d7   : > { %v3860_v56 = vpop.f32.mrf.mxu1  ;;  %v1587_v5 = vmul.f32 1.442695, %v1585_v3  ;;  %v1641_v10 = vmul.f32 1.442695, %v1639_v6  ;;  %v1695_v42 = vmul.f32 1.442695, %v1693_v11 }
 0x1d8   : > { %4014 = vpow2.f32 %v1479_v61  ;;  %v1747_v43 = vmul.f32 -50.0, %v1745_v38  ;;  %v3615_v44 = vadd.f32 0.15, %v4637_v33  ;;  %v1801_v16 = vmul.f32 -50.0, %v1799_v41 }
 0x1d9   : > { %4016 = vpow2.f32 %v1424_v62  ;;  %v3618_v17 = vadd.f32 0.05, %v4637_v33  ;;  %v3621_v25 = vadd.f32 -0.05, %v4637_v33  ;;  %v3624_v49 = vadd.f32 -0.15, %v4637_v33 }
 0x1da   : > { %4018 = vpow2.f32 %v1533_v0  ;;  %v1749_v19 = vmul.f32 1.442695, %v1747_v43  ;;  %v1853_v20 = vmul.f32 %v3615_v44, %v3615_v44  ;;  %v1803_v24 = vmul.f32 1.442695, %v1801_v16 }
 0x1db   : > { %4020 = vpow2.f32 %v1587_v5  ;;  %v1907_v29 = vmul.f32 %v3618_v17, %v3618_v17  ;;  %v1961_v51 = vmul.f32 %v3621_v25, %v3621_v25  ;;  %v2015_v59 = vmul.f32 %v3624_v49, %v3624_v49 }
 0x1dc   : > { %4022 = vpow2.f32 %v1641_v10  ;;  %v1855_v27 = vmul.f32 -50.0, %v1853_v20  ;;  %v3630_v36 = vadd.f32 -0.35, %v4637_v33 }
 0x1dd   : > { %4024 = vpow2.f32 %v1695_v42  ;;  %v1909_v45 = vmul.f32 -50.0, %v1907_v29  ;;  %v1963_v61 = vmul.f32 -50.0, %v1961_v51  ;;  %v2017_v4 = vmul.f32 -50.0, %v2015_v59 }
 0x1de   : > { %v1174_v7 = vpop.f32.mrf.mxu0  ;;  %4026 = vpow2.f32 %v1749_v19  ;;  %v1857_v50 = vmul.f32 1.442695, %v1855_v27 }
 0x1df   : > { %v1409_v2 = vpop.f32.mrf.mxu1  ;;  %v1175_v40 = vadd.f32 %v1174_v7, %v1095_v9  ;;  %4028 = vpow2.f32 %v1803_v24  ;;  %v1911_v60 = vmul.f32 1.442695, %v1909_v45  ;;  %v1965_v5 = vmul.f32 1.442695, %v1963_v61 }
 0x1e0   : > { %v3849_v39 = vpop.f32.mrf.mxu0  ;;  %4030 = vpow2.f32 %v1857_v50  ;;  %v2019_v9 = vmul.f32 1.442695, %v2017_v4 }
 0x1e1   : > { %v3882_v12 = vpop.f32.mrf.mxu1  ;;  %v1252_v14 = vadd.f32 %v1251_v57, %v1175_v40  ;;  %v3627_v57 = vadd.f32 -0.25, %v4637_v33  ;;  %v2123_v39 = vmul.f32 %v3630_v36, %v3630_v36 }
 0x1e2   : > { %v3633_v12 = vadd.f32 -0.45, %v4637_v33 }
 0x1e3   : > { %v2069_v6 = vmul.f32 %v3627_v57, %v3627_v57  ;;  %v2125_v44 = vmul.f32 -50.0, %v2123_v39 }
 0x1e5   : > { %v4015_v46 = vpop.eup %4014  ;;  %v2071_v10 = vmul.f32 -50.0, %v2069_v6 }
 0x1e6   : > { %v4017_v13 = vpop.eup %4016  ;;  %1483 = vadd.xlane.f32.xlu0 %v4015_v46  ;;  %v3636_v46 = vadd.f32 -0.55, %v4637_v33 }
 0x1e7   : > { %v1334_v15 = vpop.f32.mrf.mxu0  ;;  %1428 = vadd.xlane.f32.xlu1 %v4017_v13  ;;  %v4019_v21 = vpop.eup %4018  ;;  %v2073_v13 = vmul.f32 1.442695, %v2071_v10 }
 0x1e8   : > { %v1335_v18 = vadd.f32 %v1334_v15, %v1252_v14  ;;  %v4021_v30 = vpop.eup %4020  ;;  %v2177_v14 = vmul.f32 %v3633_v12, %v3633_v12  ;;  %v2231_v25 = vmul.f32 %v3636_v46, %v3636_v46 }
 0x1e9   : > { %v3871_v22 = vpop.f32.mrf.mxu0  ;;  %v4023_v52 = vpop.eup %4022 }
 0x1ea   : > { %v1410_v23 = vadd.f32 %v1409_v2, %v1335_v18  ;;  %1537 = vadd.xlane.f32.xlu0 %v4019_v21  ;;  %v4025_v56 = vpop.eup %4024  ;;  %v2127_v21 = vmul.f32 1.442695, %v2125_v44  ;;  %v3639_v22 = vadd.f32 -0.65, %v4637_v33  ;;  %v2233_v50 = vmul.f32 -50.0, %v2231_v25 }
 0x1eb   : > { %v4027_v7 = vpop.eup %4026 }
 0x1ec   : > { %v4652_v26 = vsel %vm1415_vm10, %v1410_v23, 10000.0  ;;  %v4029_v40 = vpop.eup %4028  ;;  %v2179_v23 = vmul.f32 -50.0, %v2177_v14  ;;  %v2235_v59 = vmul.f32 1.442695, %v2233_v50 }
 0x1ed   : > { %v3592_v31 = vadd.f32 0.95, %v4652_v26  ;;  %v3595_v32 = vadd.f32 0.85, %v4652_v26  ;;  %v3598_v34 = vadd.f32 0.75, %v4652_v26  ;;  %v3613_v15 = vadd.f32 0.25, %v4652_v26  ;;  %v4031_v16 = vpop.eup %4030 }
 0x1ee   : > { %1591 = vadd.xlane.f32.xlu0 %v4021_v30  ;;  %v3601_v55 = vadd.f32 0.65, %v4652_v26  ;;  %v3604_v62 = vadd.f32 0.55, %v4652_v26  ;;  %v3607_v37 = vadd.f32 0.45, %v4652_v26 }
 0x1ef   : > { %v1421_v35 = vmul.f32 %v3592_v31, %v3592_v31  ;;  %v1476_v48 = vmul.f32 %v3595_v32, %v3595_v32  ;;  %v1530_v54 = vmul.f32 %v3598_v34, %v3598_v34  ;;  %v3610_v11 = vadd.f32 0.35, %v4652_v26 }
 0x1f0   : > { %v1584_v3 = vmul.f32 %v3601_v55, %v3601_v55  ;;  %v1638_v8 = vmul.f32 %v3604_v62, %v3604_v62  ;;  %v1692_v43 = vmul.f32 %v3607_v37, %v3607_v37  ;;  %v1800_v24 = vmul.f32 %v3613_v15, %v3613_v15 }
 0x1f1   : > { %v1423_v53 = vmul.f32 -50.0, %v1421_v35  ;;  %v1478_v1 = vmul.f32 -50.0, %v1476_v48  ;;  %v1532_v0 = vmul.f32 -50.0, %v1530_v54  ;;  %v1746_v19 = vmul.f32 %v3610_v11, %v3610_v11 }
 0x1f2   : > { %1645 = vadd.xlane.f32.xlu0 %v4023_v52  ;;  %v1586_v38 = vmul.f32 -50.0, %v1584_v3  ;;  %v1640_v42 = vmul.f32 -50.0, %v1638_v8  ;;  %v1694_v18 = vmul.f32 -50.0, %v1692_v43  ;;  %v3616_v31 = vadd.f32 0.15, %v4652_v26 }
 0x1f3   : > { %v1426_v58 = vmul.f32 1.442695, %v1423_v53  ;;  %v1481_v63 = vmul.f32 1.442695, %v1478_v1  ;;  %v1535_v2 = vmul.f32 1.442695, %v1532_v0  ;;  %v2285_v34 = vmul.f32 %v3639_v22, %v3639_v22 }
 0x1f4   : > { %v1589_v41 = vmul.f32 1.442695, %v1586_v38  ;;  %v1643_v17 = vmul.f32 1.442695, %v1640_v42  ;;  %v1697_v29 = vmul.f32 1.442695, %v1694_v18  ;;  %v1854_v52 = vmul.f32 %v3616_v31, %v3616_v31 }
 0x1f5   : > { %4032 = vpow2.f32 %v1426_v58  ;;  %v1748_v30 = vmul.f32 -50.0, %v1746_v19  ;;  %v3642_v35 = vadd.f32 -0.75, %v4637_v33  ;;  %v2181_v48 = vmul.f32 1.442695, %v2179_v23 }
 0x1f6   : > { %1699 = vadd.xlane.f32.xlu0 %v4025_v56  ;;  %4034 = vpow2.f32 %v1911_v60  ;;  %v1802_v49 = vmul.f32 -50.0, %v1800_v24  ;;  %v3619_v53 = vadd.f32 0.05, %v4652_v26  ;;  %v3645_v55 = vadd.f32 -0.85, %v4637_v33 }
 0x1f7   : > { %4036 = vpow2.f32 %v1481_v63  ;;  %v1751_v51 = vmul.f32 1.442695, %v1748_v30  ;;  %v2339_v54 = vmul.f32 %v3642_v35, %v3642_v35  ;;  %v2287_v57 = vmul.f32 -50.0, %v2285_v34 }
 0x1f8   : > { %4038 = vpow2.f32 %v1965_v5  ;;  %v1805_v58 = vmul.f32 1.442695, %v1802_v49  ;;  %v1856_v61 = vmul.f32 -50.0, %v1854_v52  ;;  %v1908_v62 = vmul.f32 %v3619_v53, %v3619_v53 }
 0x1f9   : > { %4040 = vpow2.f32 %v1535_v2  ;;  %v3622_v56 = vadd.f32 -0.05, %v4652_v26  ;;  %v2393_v0 = vmul.f32 %v3645_v55, %v3645_v55  ;;  %v3648_v3 = vadd.f32 -0.95, %v4637_v33 }
 0x1fa   : > { %1753 = vadd.xlane.f32.xlu0 %v4027_v7  ;;  %4042 = vpow2.f32 %v2019_v9  ;;  %v2289_v4 = vmul.f32 1.442695, %v2287_v57  ;;  %v2341_v36 = vmul.f32 -50.0, %v2339_v54  ;;  %v3625_v5 = vadd.f32 -0.15, %v4652_v26 }
 0x1fb   : > { %4044 = vpow2.f32 %v1589_v41  ;;  %v1859_v37 = vmul.f32 1.442695, %v1856_v61  ;;  %v1910_v7 = vmul.f32 -50.0, %v1908_v62  ;;  %v1962_v2 = vmul.f32 %v3622_v56, %v3622_v56 }
 0x1fc   : > { %4046 = vpow2.f32 %v2073_v13  ;;  %v2447_v8 = vmul.f32 %v3648_v3, %v3648_v3  ;;  %v3651_v9 = vadd.f32 -1.0, %v4637_v33  ;;  %v2343_v39 = vmul.f32 1.442695, %v2341_v36 }
 0x1fd   : > { %4048 = vpow2.f32 %v1643_v17  ;;  %v2395_v10 = vmul.f32 -50.0, %v2393_v0  ;;  %v3628_v11 = vadd.f32 -0.25, %v4652_v26  ;;  %v1964_v41 = vmul.f32 -50.0, %v1962_v2 }
 0x1fe   : > { %1807 = vadd.xlane.f32.xlu0 %v4029_v40  ;;  %4050 = vpow2.f32 %v2127_v21  ;;  %v1913_v40 = vmul.f32 1.442695, %v1910_v7  ;;  %v2016_v42 = vmul.f32 %v3625_v5, %v3625_v5  ;;  %v2449_v44 = vmul.f32 -50.0, %v2447_v8 }
 0x1ff   : > { %4052 = vpow2.f32 %v1697_v29  ;;  %v2397_v46 = vmul.f32 1.442695, %v2395_v10  ;;  %v2070_v13 = vmul.f32 %v3628_v11, %v3628_v11  ;;  %v2501_v14 = vmul.f32 %v3651_v9, %v3651_v9 }
 0x200   : > { %4054 = vpow2.f32 %v2181_v48  ;;  %v1967_v33 = vmul.f32 1.442695, %v1964_v41  ;;  %v3631_v17 = vadd.f32 -0.35, %v4652_v26  ;;  %v2451_v19 = vmul.f32 1.442695, %v2449_v44 }
 0x201   : > { %4056 = vpow2.f32 %v1751_v51  ;;  %v2503_v21 = vmul.f32 -500000.0, %v2501_v14  ;;  %v3634_v25 = vadd.f32 -0.45, %v4652_v26  ;;  %v3637_v35 = vadd.f32 -0.55, %v4652_v26 }
 0x202   : > { %v4033_v20 = vpop.eup %4032  ;;  %1861 = vadd.xlane.f32.xlu0 %v4031_v16  ;;  %4058 = vpow2.f32 %v2235_v59  ;;  %v2018_v16 = vmul.f32 -50.0, %v2016_v42  ;;  %v2124_v24 = vmul.f32 %v3631_v17, %v3631_v17  ;;  %v3640_v49 = vadd.f32 -0.65, %v4652_v26 }
 0x203   : > { %1430 = vadd.xlane.f32.xlu1 %v4033_v20  ;;  %v4035_v27 = vpop.eup %4034  ;;  %4060 = vpow2.f32 %v1805_v58  ;;  %v2072_v20 = vmul.f32 -50.0, %v2070_v13  ;;  %v2505_v30 = vmul.f32 1.442695, %v2503_v21  ;;  %v2178_v34 = vmul.f32 %v3634_v25, %v3634_v25 }
 0x204   : > { %v4037_v32 = vpop.eup %4036  ;;  %4062 = vpow2.f32 %v2289_v4  ;;  %v2021_v23 = vmul.f32 1.442695, %v2018_v16  ;;  %v2232_v52 = vmul.f32 %v3637_v35, %v3637_v35  ;;  %v2286_v59 = vmul.f32 %v3640_v49, %v3640_v49 }
 0x205   : > { %v4039_v45 = vpop.eup %4038  ;;  %4064 = vpow2.f32 %v1859_v37  ;;  %v2075_v29 = vmul.f32 1.442695, %v2072_v20  ;;  %v2180_v51 = vmul.f32 -50.0, %v2178_v34  ;;  %v3652_v8 = vadd.f32 -1.0, %v4652_v26 }
 0x206   : > { %1915 = vadd.xlane.f32.xlu0 %v4035_v27  ;;  %v4041_v1 = vpop.eup %4040  ;;  %4066 = vpow2.f32 %v2343_v39  ;;  %v2234_v58 = vmul.f32 -50.0, %v2232_v52  ;;  %v2288_v56 = vmul.f32 -50.0, %v2286_v59 }
 0x207   : > { %1485 = vadd.xlane.f32.xlu1 %v4037_v32  ;;  %v4043_v60 = vpop.eup %4042  ;;  %4068 = vpow2.f32 %v1913_v40  ;;  %v2126_v32 = vmul.f32 -50.0, %v2124_v24  ;;  %v2183_v55 = vmul.f32 1.442695, %v2180_v51  ;;  %v2502_v11 = vmul.f32 %v3652_v8, %v3652_v8 }
 0x208   : > { %v4045_v63 = vpop.eup %4044  ;;  %4070 = vpow2.f32 %v2397_v46  ;;  %v2237_v62 = vmul.f32 1.442695, %v2234_v58  ;;  %v2291_v36 = vmul.f32 1.442695, %v2288_v56 }
 0x209   : > { %v4047_v6 = vpop.eup %4046  ;;  %4072 = vpow2.f32 %v1967_v33  ;;  %v2504_v41 = vmul.f32 -500000.0, %v2502_v11 }
 0x20a   : > { %1969 = vadd.xlane.f32.xlu0 %v4039_v45  ;;  %v4049_v38 = vpop.eup %4048  ;;  %4074 = vpow2.f32 %v2451_v19  ;;  %v2129_v45 = vmul.f32 1.442695, %v2126_v32 }
 0x20b   : > { %1539 = vadd.xlane.f32.xlu1 %v4041_v1  ;;  %v4051_v12 = vpop.eup %4050  ;;  %4076 = vpow2.f32 %v2021_v23  ;;  %v3643_v1 = vadd.f32 -0.75, %v4652_v26 }
 0x20c   : > { %v4053_v43 = vpop.eup %4052  ;;  %4078 = vpow2.f32 %v2505_v30 }
 0x20d   : > { %v4055_v15 = vpop.eup %4054  ;;  %4080 = vpow2.f32 %v2075_v29 }
 0x20e   : > { %2023 = vadd.xlane.f32.xlu0 %v4043_v60  ;;  %v4057_v18 = vpop.eup %4056  ;;  %4082 = vpow2.f32 %v2129_v45  ;;  %v3646_v60 = vadd.f32 -0.85, %v4652_v26 }
 0x20f   : > { %1593 = vadd.xlane.f32.xlu1 %v4045_v63  ;;  %v4059_v22 = vpop.eup %4058  ;;  %4084 = vpow2.f32 %v2183_v55  ;;  %v2340_v63 = vmul.f32 %v3643_v1, %v3643_v1 }
 0x210   : > { %v4061_v27 = vpop.eup %4060  ;;  %v2394_v3 = vmul.f32 %v3646_v60, %v3646_v60  ;;  %4086 = vpow2.f32 %v2237_v62 }
 0x211   : > { %v4063_v31 = vpop.eup %4062  ;;  %v2342_v5 = vmul.f32 -50.0, %v2340_v63  ;;  %4088 = vpow2.f32 %v2291_v36 }
 0x212   : > { %2077 = vadd.xlane.f32.xlu0 %v4047_v6  ;;  %v4065_v48 = vpop.eup %4064  ;;  %v3649_v6 = vadd.f32 -0.95, %v4652_v26  ;;  %v2396_v7 = vmul.f32 -50.0, %v2394_v3 }
 0x213   : > { %1647 = vadd.xlane.f32.xlu1 %v4049_v38  ;;  %v4067_v50 = vpop.eup %4066  ;;  %v2345_v2 = vmul.f32 1.442695, %v2342_v5 }
 0x214   : > { %v4069_v53 = vpop.eup %4068  ;;  %v2448_v38 = vmul.f32 %v3649_v6, %v3649_v6  ;;  %v2399_v39 = vmul.f32 1.442695, %v2396_v7 }
 0x215   : > { %v4071_v54 = vpop.eup %4070  ;;  %4090 = vpow2.f32 %v2345_v2 }
 0x216   : > { %2131 = vadd.xlane.f32.xlu0 %v4051_v12  ;;  %v4073_v57 = vpop.eup %4072  ;;  %v2450_v10 = vmul.f32 -50.0, %v2448_v38  ;;  %4092 = vpow2.f32 %v2399_v39 }
 0x217   : > { %1701 = vadd.xlane.f32.xlu1 %v4053_v43  ;;  %v4075_v61 = vpop.eup %4074  ;;  %v2507_v43 = vmul.f32 1.442695, %v2504_v41 }
 0x218   : > { %v4077_v0 = vpop.eup %4076  ;;  %v2453_v40 = vmul.f32 1.442695, %v2450_v10 }
 0x219   : > { %v4079_v4 = vpop.eup %4078 }
 0x21a   : > { %2185 = vadd.xlane.f32.xlu0 %v4055_v15  ;;  %v4081_v37 = vpop.eup %4080  ;;  %4094 = vpow2.f32 %v2453_v40 }
 0x21b   : > { %1755 = vadd.xlane.f32.xlu1 %v4057_v18  ;;  %v4083_v9 = vpop.eup %4082  ;;  %4096 = vpow2.f32 %v2507_v43 }
 0x21c   : > { %v4085_v12 = vpop.eup %4084 }
 0x21d   : > { %v4087_v42 = vpop.eup %4086 }
 0x21e   : > { %2239 = vadd.xlane.f32.xlu0 %v4059_v22  ;;  %v4089_v44 = vpop.eup %4088 }
 0x21f   : > { %1809 = vadd.xlane.f32.xlu1 %v4061_v27 }
 0x222   : > { %2293 = vadd.xlane.f32.xlu0 %v4063_v31  ;;  %v4091_v46 = vpop.eup %4090 }
 0x223   : > { %1863 = vadd.xlane.f32.xlu1 %v4065_v48  ;;  %v4093_v26 = vpop.eup %4092 }
 0x226   : > { %2347 = vadd.xlane.f32.xlu0 %v4067_v50 }
 0x227   : > { %1917 = vadd.xlane.f32.xlu1 %v4069_v53  ;;  %v4095_v13 = vpop.eup %4094 }
 0x228   : > { %v4097_v14 = vpop.eup %4096 }
 0x22a   : > { %2401 = vadd.xlane.f32.xlu0 %v4071_v54 }
 0x22b   : > { %1971 = vadd.xlane.f32.xlu1 %v4073_v57 }
 0x22e   : > { %2455 = vadd.xlane.f32.xlu0 %v4075_v61 }
 0x22f   : > { %2025 = vadd.xlane.f32.xlu1 %v4077_v0 }
 0x232   : > { %2509 = vadd.xlane.f32.xlu0 %v4079_v4 }
 0x233   : > { %2079 = vadd.xlane.f32.xlu1 %v4081_v37 }
 0x237   : > { %2133 = vadd.xlane.f32.xlu1 %v4083_v9 }
 0x23b   : > { %2187 = vadd.xlane.f32.xlu1 %v4085_v12 }
 0x23f   : > { %2241 = vadd.xlane.f32.xlu1 %v4087_v42 }
 0x243   : > { %2295 = vadd.xlane.f32.xlu1 %v4089_v44 }
 0x247   : > { %2349 = vadd.xlane.f32.xlu1 %v4091_v46 }
 0x24b   : > { %2403 = vadd.xlane.f32.xlu1 %v4093_v26 }
 0x24f   : > { %2457 = vadd.xlane.f32.xlu1 %v4095_v13 }
 0x253   : > { %2511 = vadd.xlane.f32.xlu1 %v4097_v14 }
 0x26f   : > { %v1484_v15 = vpop.xlane.xlu0 %1483 }
 0x270   : > { %v1429_v16 = vpop.xlane.xlu1 %1428  ;;  %v1487_v18 = vadd.f32 1.0, %v1484_v15  ;;  %v1493_v27 = vand.u32 2147483647, %v1484_v15  ;;  %v1490_v31 = vmul.f32 -0.5, %v1484_v15 }
 0x271   : > { %v1432_v19 = vadd.f32 1.0, %v1429_v16  ;;  %v1435_v29 = vmul.f32 -0.5, %v1429_v16  ;;  %v1438_v30 = vand.u32 2147483647, %v1429_v16 }
 0x272   : > { %4098 = vlog2.f32 %v1487_v18  ;;  %vm4695_vm11 = vcmp.lt.f32.partialorder %v1493_v27, 0.0004427343  ;;  %v1491_v53 = vadd.f32 1.0, %v1490_v31 }
 0x273   : > { %v1538_v33 = vpop.xlane.xlu0 %1537  ;;  %4100 = vlog2.f32 %v1432_v19  ;;  %v1436_v51 = vadd.f32 1.0, %v1435_v29  ;;  %vm4699_vm12 = vcmp.lt.f32.partialorder %v1438_v30, 0.0004427343 }
 0x274   : > { %v1541_v20 = vadd.f32 1.0, %v1538_v33  ;;  %v1544_v32 = vmul.f32 -0.5, %v1538_v33  ;;  %v1547_v1 = vand.u32 2147483647, %v1538_v33  ;;  %v1492_v5 = vmul.f32 %v1491_v53, %v1484_v15 }
 0x275   : > { %v1437_v36 = vmul.f32 %v1436_v51, %v1429_v16 }
 0x276   : > { %4102 = vlog2.f32 %v1541_v20  ;;  %v1545_v55 = vadd.f32 1.0, %v1544_v32  ;;  %vm4712_vm13 = vcmp.lt.f32.partialorder %v1547_v1, 0.0004427343 }
 0x277   : > { %v1592_v17 = vpop.xlane.xlu0 %1591 }
 0x278   : > { %v1595_v22 = vadd.f32 1.0, %v1592_v17  ;;  %v1598_v48 = vmul.f32 -0.5, %v1592_v17  ;;  %v1601_v58 = vand.u32 2147483647, %v1592_v17  ;;  %v1546_v2 = vmul.f32 %v1545_v55, %v1538_v33 }
 0x27a   : > { %4104 = vlog2.f32 %v1595_v22  ;;  %v1599_v60 = vadd.f32 1.0, %v1598_v48  ;;  %vm4719_vm14 = vcmp.lt.f32.partialorder %v1601_v58, 0.0004427343 }
 0x27b   : > { %v4685_v21 = vpop.xlane.xlu0 %1645 }
 0x27c   : > { %v1649_v24 = vadd.f32 1.0, %v4685_v21  ;;  %v1652_v59 = vmul.f32 -0.5, %v4685_v21  ;;  %v1655_v61 = vand.u32 2147483647, %v4685_v21  ;;  %v1600_v39 = vmul.f32 %v1599_v60, %v1592_v17 }
 0x27e   : > { %4106 = vlog2.f32 %v1649_v24  ;;  %v1653_v38 = vadd.f32 1.0, %v1652_v59  ;;  %vm4725_vm15 = vcmp.lt.f32.partialorder %v1655_v61, 0.0004427343 }
 0x27f   : > { %v4687_v23 = vpop.xlane.xlu0 %1699  ;;  %v4099_v49 = vpop.eup %4098 }
 0x280   : > { %v1703_v34 = vadd.f32 1.0, %v4687_v23  ;;  %v4101_v45 = vpop.eup %4100  ;;  %v1706_v62 = vmul.f32 -0.5, %v4687_v23  ;;  %v1489_v3 = vmul.f32 0.6931472, %v4099_v49  ;;  %v1709_v41 = vand.u32 2147483647, %v4687_v23 }
 0x281   : > { %v1434_v0 = vmul.f32 0.6931472, %v4101_v45  ;;  %v1654_v33 = vmul.f32 %v1653_v38, %v4685_v21 }
 0x282   : > { %4108 = vlog2.f32 %v1703_v34  ;;  %v1707_v11 = vadd.f32 1.0, %v1706_v62  ;;  %v1495_v44 = vsel %vm4695_vm11, %v1492_v5, %v1489_v3  ;;  %vm4761_vm0 = vcmp.lt.f32.partialorder %v1709_v41, 0.0004427343 }
 0x283   : > { %v4690_v25 = vpop.xlane.xlu0 %1753  ;;  %v4103_v54 = vpop.eup %4102  ;;  %v1440_v43 = vsel %vm4699_vm12, %v1437_v36, %v1434_v0  ;;  %v4751_v27 = vrot.slane %v1495_v44, %v4632_v47 }
 0x284   : > { %v1757_v56 = vadd.f32 1.0, %v4690_v25  ;;  %v1543_v6 = vmul.f32 0.6931472, %v4103_v54  ;;  %v1760_v8 = vmul.f32 -0.5, %v4690_v25  ;;  %v4744_v19 = vmul.f32 %v1707_v11, %v4687_v23 }
 0x285   : > { %v1763_v21 = vand.u32 2147483647, %v4690_v25  ;;  %v4756_v30 = vrot.slane %v1440_v43, %v4632_v47 }
 0x286   : > { %v1549_v14 = vsel %vm4712_vm13, %v1546_v2, %v1543_v6  ;;  %v1761_v16 = vadd.f32 1.0, %v1760_v8 }
 0x287   : > { %v4693_v35 = vpop.xlane.xlu0 %1807  ;;  %v4105_v7 = vpop.eup %4104  ;;  %v4759_v31 = vrot.slane %v1549_v14, %v4632_v47  ;;  %vm4797_vm5 = vcmp.lt.f32.partialorder %v1763_v21, 0.0004427343 }
 0x288   : > { %v1597_v46 = vmul.f32 0.6931472, %v4105_v7  ;;  %v1811_v26 = vadd.f32 1.0, %v4693_v35  ;;  %v1814_v13 = vmul.f32 -0.5, %v4693_v35  ;;  %v4768_v49 = vmul.f32 %v1761_v16, %v4690_v25 }
 0x289   : > { %v1817_v25 = vand.u32 2147483647, %v4693_v35 }
 0x28a   : > { %v1815_v34 = vadd.f32 1.0, %v1814_v13  ;;  %v1603_v48 = vsel %vm4719_vm14, %v1600_v39, %v1597_v46 }
 0x28b   : > { %v4704_v57 = vpop.xlane.xlu0 %1861  ;;  %v4107_v15 = vpop.eup %4106  ;;  %v4781_v60 = vrot.slane %v1603_v48, %v4632_v47  ;;  %vm5007_vm12 = vcmp.lt.f32.partialorder %v1817_v25, 0.0004427343 }
 0x28c   : > { %v4709_v63 = vpop.xlane.xlu1 %1430  ;;  %v1865_v17 = vadd.f32 1.0, %v4704_v57  ;;  %v1868_v22 = vmul.f32 -0.5, %v4704_v57  ;;  %v1651_v23 = vmul.f32 0.6931472, %v4107_v15  ;;  %v4784_v61 = vmul.f32 %v1815_v34, %v4693_v35 }
 0x28d   : > { %v1441_v4 = vadd.f32 1.0, %v4709_v63  ;;  %v1444_v20 = vmul.f32 -0.5, %v4709_v63  ;;  %v1447_v50 = vand.u32 2147483647, %v4709_v63 }
 0x28e   : > { %v1869_v1 = vadd.f32 1.0, %v1868_v22  ;;  %v1657_v0 = vsel %vm4725_vm15, %v1654_v33, %v1651_v23 }
 0x28f   : > { %4110 = vlog2.f32 %v1441_v4  ;;  %v4717_v9 = vpop.xlane.xlu0 %1915  ;;  %v4109_v52 = vpop.eup %4108  ;;  %v1445_v53 = vadd.f32 1.0, %v1444_v20  ;;  %vm4790_vm4 = vcmp.lt.f32.partialorder %v1447_v50, 0.0004427343  ;;  %v4809_v41 = vrot.slane %v1657_v0, %v4632_v47 }
 0x290   : > { %4112 = vlog2.f32 %v1757_v56  ;;  %v4723_v12 = vpop.xlane.xlu1 %1485  ;;  %v1919_v45 = vadd.f32 1.0, %v4717_v9  ;;  %v1922_v54 = vmul.f32 -0.5, %v4717_v9  ;;  %v1871_v56 = vand.u32 2147483647, %v4704_v57 }
 0x291   : > { %v1496_v42 = vadd.f32 1.0, %v4723_v12  ;;  %v1499_v58 = vmul.f32 -0.5, %v4723_v12  ;;  %v1502_v62 = vand.u32 2147483647, %v4723_v12  ;;  %v1705_v3 = vmul.f32 0.6931472, %v4109_v52 }
 0x292   : > { %v1446_v7 = vmul.f32 %v1445_v53, %v4709_v63  ;;  %v4803_v2 = vmul.f32 %v1869_v1, %v4704_v57  ;;  %v1923_v38 = vadd.f32 1.0, %v1922_v54  ;;  %vm5043_vm14 = vcmp.lt.f32.partialorder %v1871_v56, 0.0004427343 }
 0x293   : > { %4114 = vlog2.f32 %v1496_v42  ;;  %v4741_v18 = vpop.xlane.xlu0 %1969  ;;  %v1500_v11 = vadd.f32 1.0, %v1499_v58  ;;  %vm4811_vm6 = vcmp.lt.f32.partialorder %v1502_v62, 0.0004427343  ;;  %v1711_v14 = vsel %vm4761_vm0, %v4744_v19, %v1705_v3 }
 0x294   : > { %v4748_v24 = vpop.xlane.xlu1 %1539  ;;  %4116 = vlog2.f32 %v1811_v26  ;;  %v1973_v36 = vadd.f32 1.0, %v4741_v18  ;;  %v1976_v43 = vmul.f32 -0.5, %v4741_v18  ;;  %v4853_v62 = vrot.slane %v1711_v14, %v4632_v47 }
 0x295   : > { %v1550_v29 = vadd.f32 1.0, %v4748_v24  ;;  %4118 = vlog2.f32 %v1865_v17  ;;  %v1553_v63 = vmul.f32 -0.5, %v4748_v24  ;;  %v1556_v16 = vand.u32 2147483647, %v4748_v24 }
 0x296   : > { %v4828_v17 = vmul.f32 %v1923_v38, %v4717_v9  ;;  %v1977_v19 = vadd.f32 1.0, %v1976_v43 }
 0x297   : > { %v4772_v51 = vpop.xlane.xlu0 %2023  ;;  %4120 = vlog2.f32 %v1550_v29  ;;  %v1501_v29 = vmul.f32 %v1500_v11, %v4723_v12  ;;  %v1554_v32 = vadd.f32 1.0, %v1553_v63  ;;  %vm4841_vm7 = vcmp.lt.f32.partialorder %v1556_v16, 0.0004427343 }
 0x298   : > { %v4775_v55 = vpop.xlane.xlu1 %1593  ;;  %4122 = vlog2.f32 %v1919_v45  ;;  %v2027_v44 = vadd.f32 1.0, %v4772_v51  ;;  %v2030_v52 = vmul.f32 -0.5, %v4772_v51 }
 0x299   : > { %v1604_v59 = vadd.f32 1.0, %v4775_v55  ;;  %v1607_v23 = vmul.f32 -0.5, %v4775_v55  ;;  %v1610_v45 = vand.u32 2147483647, %v4775_v55  ;;  %v1555_v38 = vmul.f32 %v1554_v32, %v4748_v24 }
 0x29a   : > { %v2031_v42 = vadd.f32 1.0, %v2030_v52 }
 0x29b   : > { %v4795_v5 = vpop.xlane.xlu0 %2077  ;;  %4124 = vlog2.f32 %v1604_v59  ;;  %v1608_v3 = vadd.f32 1.0, %v1607_v23  ;;  %vm4867_vm8 = vcmp.lt.f32.partialorder %v1610_v45, 0.0004427343 }
 0x29c   : > { %v4111_v6 = vpop.eup %4110  ;;  %v4805_v8 = vpop.xlane.xlu1 %1647  ;;  %4126 = vlog2.f32 %v1973_v36  ;;  %v2081_v54 = vadd.f32 1.0, %v4795_v5  ;;  %v2084_v63 = vmul.f32 -0.5, %v4795_v5  ;;  %v4890_v32 = vmul.f32 %v2031_v42, %v4772_v51 }
 0x29d   : > { %v4113_v39 = vpop.eup %4112  ;;  %v1443_v10 = vmul.f32 0.6931472, %v4111_v6  ;;  %v1658_v46 = vadd.f32 1.0, %v4805_v8  ;;  %4128 = vlog2.f32 %v2027_v44  ;;  %v1661_v4 = vmul.f32 -0.5, %v4805_v8 }
 0x29e   : > { %v1759_v33 = vmul.f32 0.6931472, %v4113_v39  ;;  %v4864_v39 = vmul.f32 %v1977_v19, %v4741_v18  ;;  %v1609_v14 = vmul.f32 %v1608_v3, %v4775_v55  ;;  %v1664_v16 = vand.u32 2147483647, %v4805_v8 }
 0x29f   : > { %v1449_v26 = vsel %vm4790_vm4, %v1446_v7, %v1443_v10  ;;  %v4821_v13 = vpop.xlane.xlu0 %2131  ;;  %4130 = vlog2.f32 %v1658_v46  ;;  %v2085_v19 = vadd.f32 1.0, %v2084_v63 }
 0x2a0   : > { %v4115_v15 = vpop.eup %4114  ;;  %v4830_v20 = vpop.xlane.xlu1 %1701  ;;  %v1459_v22 = vrot.slane %v1449_v26, %v4632_v47  ;;  %v1765_v6 = vsel %vm4797_vm5, %v4768_v49, %v1759_v33  ;;  %4132 = vlog2.f32 %v2081_v54  ;;  %v2135_v33 = vadd.f32 1.0, %v4821_v13 }
 0x2a1   : > { %v1498_v21 = vmul.f32 0.6931472, %v4115_v15  ;;  %v4117_v50 = vpop.eup %4116  ;;  %v1712_v36 = vadd.f32 1.0, %v4830_v20  ;;  %v4878_v46 = vrot.slane %v1765_v6, %v4632_v47  ;;  %v1662_v15 = vadd.f32 1.0, %v1661_v4 }
 0x2a2   : > { %v1461_v48 = vsel %vm1460_vm1, %v1459_v22, %v4756_v30  ;;  %v4119_v1 = vpop.eup %4118  ;;  %v4860_v7 = vmul.f32 0.6931472, %v4117_v50  ;;  %v1715_v22 = vmul.f32 -0.5, %v4830_v20  ;;  %v2138_v55 = vmul.f32 -0.5, %v4821_v13 }
 0x2a3   : > { %v1464_v53 = vsel %vm1463_vm2, %v1461_v48, 0.0  ;;  %v1504_v30 = vsel %vm4811_vm6, %v1501_v29, %v1498_v21  ;;  %v4850_v59 = vpop.xlane.xlu0 %2185  ;;  %v4873_v49 = vmul.f32 0.6931472, %v4119_v1  ;;  %4134 = vlog2.f32 %v1712_v36 }
 0x2a4   : > { %1465 = vadd.xlane.f32.xlu0 %v1464_v53  ;;  %v4846_v58 = vpop.xlane.xlu1 %1755  ;;  %v4121_v0 = vpop.eup %4120  ;;  %v1514_v43 = vrot.slane %v1504_v30, %v4632_v47  ;;  %v2189_v53 = vadd.f32 1.0, %v4850_v59  ;;  %v1663_v30 = vmul.f32 %v1662_v15, %v4805_v8  ;;  %4136 = vlog2.f32 %v2135_v33 }
 0x2a5   : > { %v4123_v37 = vpop.eup %4122  ;;  %v1552_v44 = vmul.f32 0.6931472, %v4121_v0  ;;  %v1766_v21 = vadd.f32 1.0, %v4846_v58  ;;  %v1769_v52 = vmul.f32 -0.5, %v4846_v58  ;;  %vm4904_vm9 = vcmp.lt.f32.partialorder %v1664_v16, 0.0004427343 }
 0x2a6   : > { %v1515_v29 = vsel %vm1460_vm1, %v1514_v43, %v4751_v27  ;;  %v4900_v54 = vmul.f32 0.6931472, %v4123_v37  ;;  %v1716_v4 = vadd.f32 1.0, %v1715_v22  ;;  %v4914_v8 = vmul.f32 %v2085_v19, %v4795_v5 }
 0x2a7   : > { %v4887_v23 = vpop.xlane.xlu0 %2239  ;;  %v1517_v48 = vsel %vm1463_vm2, %v1515_v29, 0.0  ;;  %v1558_v27 = vsel %vm4841_vm7, %v1555_v38, %v1552_v44  ;;  %4138 = vlog2.f32 %v1766_v21  ;;  %v1718_v38 = vand.u32 2147483647, %v4830_v20 }
 0x2a8   : > { %v4875_v24 = vpop.xlane.xlu1 %1809  ;;  %v4125_v26 = vpop.eup %4124  ;;  %1518 = vadd.xlane.f32.xlu1 %v1517_v48  ;;  %v1568_v6 = vrot.slane %v1558_v27, %v4632_v47  ;;  %v2139_v63 = vadd.f32 1.0, %v2138_v55  ;;  %v1770_v37 = vadd.f32 1.0, %v1769_v52  ;;  %4140 = vlog2.f32 %v2189_v53 }
 0x2a9   : > { %v4127_v50 = vpop.eup %4126  ;;  %v1606_v45 = vmul.f32 0.6931472, %v4125_v26  ;;  %v1820_v36 = vadd.f32 1.0, %v4875_v24  ;;  %v1823_v16 = vmul.f32 -0.5, %v4875_v24  ;;  %v2192_v22 = vmul.f32 -0.5, %v4850_v59 }
 0x2aa   : > { %v4129_v42 = vpop.eup %4128  ;;  %v4910_v12 = vmul.f32 0.6931472, %v4127_v50  ;;  %v1569_v44 = vsel %vm1460_vm1, %v1568_v6, %v4759_v31  ;;  %v4929_v19 = vmul.f32 %v1716_v4, %v4830_v20  ;;  %v1772_v31 = vand.u32 2147483647, %v4846_v58 }
 0x2ab   : > { %v1612_v15 = vsel %vm4867_vm8, %v1609_v14, %v1606_v45  ;;  %v4922_v33 = vpop.xlane.xlu0 %2293  ;;  %v1571_v29 = vsel %vm1463_vm2, %v1569_v44, 0.0  ;;  %4142 = vlog2.f32 %v1820_v36  ;;  %v2243_v11 = vadd.f32 1.0, %v4887_v23 }
 0x2ac   : > { %v4896_v1 = vpop.xlane.xlu1 %1863  ;;  %v4131_v43 = vpop.eup %4130  ;;  %1572 = vadd.xlane.f32.xlu0 %v1571_v29  ;;  %v4933_v55 = vmul.f32 0.6931472, %v4129_v42  ;;  %v1622_v50 = vrot.slane %v1612_v15, %v4632_v47  ;;  %vm4937_vm10 = vcmp.lt.f32.partialorder %v1718_v38, 0.0004427343  ;;  %v4942_v20 = vmul.f32 %v1770_v37, %v4846_v58 }
 0x2ad   : > { %v1874_v21 = vadd.f32 1.0, %v4896_v1  ;;  %v1660_v14 = vmul.f32 0.6931472, %v4131_v43  ;;  %v4945_v52 = vmul.f32 %v2139_v63, %v4821_v13  ;;  %v1877_v53 = vmul.f32 -0.5, %v4896_v1  ;;  %v4133_v36 = vpop.eup %4132 }
 0x2ae   : > { %v2246_v27 = vmul.f32 -0.5, %v4887_v23  ;;  %v1824_v6 = vadd.f32 1.0, %v1823_v16  ;;  %v2193_v42 = vadd.f32 1.0, %v2192_v22  ;;  %v1623_v38 = vsel %vm1460_vm1, %v1622_v50, %v4781_v60 }
 0x2af   : > { %4144 = vlog2.f32 %v1874_v21  ;;  %v1826_v58 = vand.u32 2147483647, %v4875_v24  ;;  %v1625_v37 = vsel %vm1463_vm2, %v1623_v38, 0.0  ;;  %v4956_v44 = vpop.xlane.xlu0 %2347  ;;  %v2297_v16 = vadd.f32 1.0, %v4922_v33 }
 0x2b0   : > { %v4918_v26 = vpop.xlane.xlu1 %1917  ;;  %v4135_v43 = vpop.eup %4134  ;;  %4146 = vlog2.f32 %v2243_v11  ;;  %1626 = vadd.xlane.f32.xlu1 %v1625_v37  ;;  %v1666_v60 = vsel %vm4904_vm9, %v1663_v30, %v1660_v14  ;;  %v4963_v22 = vmul.f32 0.6931472, %v4133_v36  ;;  %v1878_v21 = vadd.f32 1.0, %v1877_v53 }
 0x2b1   : > { %v1928_v63 = vadd.f32 1.0, %v4918_v26  ;;  %v1931_v29 = vmul.f32 -0.5, %v4918_v26  ;;  %v2247_v11 = vadd.f32 1.0, %v2246_v27  ;;  %v1676_v50 = vrot.slane %v1666_v60, %v4632_v47  ;;  %v4137_v3 = vpop.eup %4136 }
 0x2b2   : > { %v1714_v38 = vmul.f32 0.6931472, %v4135_v43  ;;  %vm4968_vm11 = vcmp.lt.f32.partialorder %v1772_v31, 0.0004427343  ;;  %v4973_v37 = vmul.f32 %v1824_v6, %v4875_v24  ;;  %v4976_v15 = vmul.f32 %v2193_v42, %v4850_v59 }
 0x2b3   : > { %v2300_v30 = vmul.f32 -0.5, %v4922_v33  ;;  %v1880_v14 = vand.u32 2147483647, %v4896_v1  ;;  %4148 = vlog2.f32 %v1928_v63  ;;  %v1677_v31 = vsel %vm1460_vm1, %v1676_v50, %v4809_v41  ;;  %v4993_v0 = vpop.xlane.xlu0 %2401 }
 0x2b4   : > { %v4949_v4 = vpop.xlane.xlu1 %1971  ;;  %v4139_v27 = vpop.eup %4138  ;;  %v1932_v43 = vadd.f32 1.0, %v1931_v29  ;;  %4150 = vlog2.f32 %v2297_v16  ;;  %v1679_v24 = vsel %vm1463_vm2, %v1677_v31, 0.0  ;;  %v4986_v6 = vmul.f32 %v1878_v21, %v4896_v1 }
 0x2b5   : > { %v1982_v53 = vadd.f32 1.0, %v4949_v4  ;;  %v4989_v42 = vmul.f32 %v2247_v11, %v4887_v23  ;;  %v1934_v63 = vand.u32 2147483647, %v4918_v26  ;;  %v1985_v60 = vmul.f32 -0.5, %v4949_v4  ;;  %1680 = vadd.xlane.f32.xlu0 %v1679_v24  ;;  %v4141_v50 = vpop.eup %4140 }
 0x2b6   : > { %v4997_v29 = vmul.f32 0.6931472, %v4137_v3  ;;  %v2301_v16 = vadd.f32 1.0, %v2300_v30  ;;  %v2351_v31 = vadd.f32 1.0, %v4956_v44  ;;  %v1720_v1 = vsel %vm4937_vm10, %v4929_v19, %v1714_v38 }
 0x2b7   : > { %v1768_v21 = vmul.f32 0.6931472, %v4139_v27  ;;  %4152 = vlog2.f32 %v1982_v53  ;;  %v2354_v11 = vmul.f32 -0.5, %v4956_v44  ;;  %v1730_v24 = vrot.slane %v1720_v1, %v4632_v47 }
 0x2b8   : > { %v4966_v28 = vpop.xlane.xlu1 %2025  ;;  %v4143_v36 = vpop.eup %4142  ;;  %vm5011_vm13 = vcmp.lt.f32.partialorder %v1826_v58, 0.0004427343  ;;  %v5016_v45 = vmul.f32 %v1932_v43, %v4918_v26  ;;  %v5021_v53 = vmul.f32 0.6931472, %v4141_v50  ;;  %v1986_v35 = vadd.f32 1.0, %v1985_v60 }
 0x2b9   : > { %v2036_v38 = vadd.f32 1.0, %v4966_v28  ;;  %v2039_v3 = vmul.f32 -0.5, %v4966_v28  ;;  %v1988_v25 = vand.u32 2147483647, %v4949_v4  ;;  %v1731_v58 = vsel %vm1460_vm1, %v1730_v24, %v4853_v62  ;;  %v5037_v24 = vpop.xlane.xlu0 %2455 }
 0x2ba   : > { %v5029_v1 = vmul.f32 %v2301_v16, %v4922_v33  ;;  %4154 = vlog2.f32 %v2351_v31  ;;  %v1733_v26 = vsel %vm1463_vm2, %v1731_v58, 0.0  ;;  %v2405_v43 = vadd.f32 1.0, %v4993_v0 }
 0x2bb   : > { %v1822_v34 = vmul.f32 0.6931472, %v4143_v36  ;;  %v2355_v50 = vadd.f32 1.0, %v2354_v11  ;;  %1734 = vadd.xlane.f32.xlu1 %v1733_v26  ;;  %v1774_v62 = vsel %vm4968_vm11, %v4942_v20, %v1768_v21  ;;  %4156 = vlog2.f32 %v2036_v38 }
 0x2bc   : > { %v4995_v41 = vpop.xlane.xlu1 %2079  ;;  %5598 = vst [vmem:[#allocation6_spill] sm:$0xff] %v5029_v1  ;;  %v4145_v19 = vpop.eup %4144  ;;  %v2040_v16 = vadd.f32 1.0, %v2039_v3  ;;  %v1784_v58 = vrot.slane %v1774_v62, %v4632_v47  ;;  %vm5047_vm15 = vcmp.lt.f32.partialorder %v1880_v14, 0.0004427343  ;;  %v5052_v48 = vmul.f32 %v1986_v35, %v4949_v4 }
 0x2bd   : > { %v4147_v40 = vpop.eup %4146  ;;  %v2090_v31 = vadd.f32 1.0, %v4995_v41  ;;  %v2042_v20 = vand.u32 2147483647, %v4966_v28  ;;  %v2408_v21 = vmul.f32 -0.5, %v4993_v0  ;;  %v2093_v38 = vmul.f32 -0.5, %v4995_v41 }
 0x2be   : > { %v1876_v57 = vmul.f32 0.6931472, %v4145_v19  ;;  %4158 = vlog2.f32 %v2405_v43  ;;  %v1785_v56 = vsel %vm1460_vm1, %v1784_v58, %v4878_v46  ;;  %v2459_v14 = vadd.f32 1.0, %v5037_v24 }
 0x2bf   : > { %v5062_v26 = vmul.f32 0.6931472, %v4147_v40  ;;  %v5065_v4 = vmul.f32 %v2355_v50, %v4956_v44  ;;  %v1787_v35 = vsel %vm1463_vm2, %v1785_v56, 0.0  ;;  %v5603_v1 = vand.u32 2147483647, %v4717_v9 }
 0x2c0   : > { %v5026_v27 = vpop.xlane.xlu1 %2133  ;;  %v4149_v60 = vpop.eup %4148  ;;  %vm5075_vm4 = vcmp.lt.f32.partialorder %v1934_v63, 0.0004427343  ;;  %v5080_v40 = vmul.f32 %v2040_v16, %v4966_v28  ;;  %4160 = vlog2.f32 %v2090_v31  ;;  %1788 = vadd.xlane.f32.xlu0 %v1787_v35  ;;  %v2462_v43 = vmul.f32 -0.5, %v5037_v24 }
 0x2c1   : > { %v2144_v62 = vadd.f32 1.0, %v5026_v27  ;;  %vm5071_vm0 = vcmp.lt.f32.partialorder %v5603_v1, 0.0004427343  ;;  %v2147_v50 = vmul.f32 -0.5, %v5026_v27  ;;  %v4151_v58 = vpop.eup %4150  ;;  %v2409_v56 = vadd.f32 1.0, %v2408_v21 }
 0x2c2   : > { %v2094_v9 = vadd.f32 1.0, %v2093_v38  ;;  %v1819_v63 = vsel %vm5007_vm12, %v4784_v61, %v4860_v7  ;;  %v1828_v1 = vsel %vm5011_vm13, %v4973_v37, %v1822_v34  ;;  %4162 = vlog2.f32 %v2459_v14 }
 0x2c3   : > { %v1834_v31 = vrot.slane %v1819_v63, %v4632_v47  ;;  %v1838_v35 = vrot.slane %v1828_v1, %v4632_v47  ;;  %v5608_v21 = vand.u32 2147483647, %v4741_v18  ;;  %v1930_v61 = vmul.f32 0.6931472, %v4149_v60 }
 0x2c4   : > { %v5057_v3 = vpop.xlane.xlu1 %2187  ;;  %vm5102_vm6 = vcmp.lt.f32.partialorder %v1988_v25, 0.0004427343  ;;  %v2096_v34 = vand.u32 2147483647, %v4995_v41  ;;  %4164 = vlog2.f32 %v2144_v62  ;;  %v4153_v37 = vpop.eup %4152  ;;  %v5108_v30 = vmul.f32 0.6931472, %v4151_v58 }
 0x2c5   : > { %vm5098_vm5 = vcmp.lt.f32.partialorder %v5608_v21, 0.0004427343  ;;  %v2198_v10 = vadd.f32 1.0, %v5057_v3  ;;  %v2463_v14 = vadd.f32 1.0, %v2462_v43  ;;  %v2148_v63 = vadd.f32 1.0, %v2147_v50  ;;  %v5119_v62 = vpop.xlane.xlu0 %2509 }
 0x2c6   : > { %v1839_v18 = vsel %vm1460_vm1, %v1838_v35, %v1834_v31  ;;  %v5112_v1 = vmul.f32 %v2409_v56, %v4993_v0  ;;  %v5115_v25 = vmul.f32 %v2094_v9, %v4995_v41  ;;  %v2465_v60 = vand.u32 2147483647, %v5037_v24 }
 0x2c7   : > { %v1841_v21 = vsel %vm1463_vm2, %v1839_v18, 0.0  ;;  %v2150_v58 = vand.u32 2147483647, %v5026_v27  ;;  %v2201_v43 = vmul.f32 -0.5, %v5057_v3  ;;  %v1873_v50 = vsel %vm5043_vm14, %v4803_v2, %v4873_v49  ;;  %v4155_v56 = vpop.eup %4154 }
 0x2c8   : > { %v5091_v28 = vpop.xlane.xlu1 %2241  ;;  %1842 = vadd.xlane.f32.xlu1 %v1841_v21  ;;  %v1882_v41 = vsel %vm5047_vm15, %v4986_v6, %v1876_v57  ;;  %v5613_v9 = vand.u32 2147483647, %v4772_v51  ;;  %v1984_v35 = vmul.f32 0.6931472, %v4153_v37  ;;  %vm5138_vm8 = vcmp.lt.f32.partialorder %v2042_v20, 0.0004427343  ;;  %v4157_v57 = vpop.eup %4156 }
 0x2c9   : > { %4166 = vlog2.f32 %v2198_v10  ;;  %v1888_v36 = vrot.slane %v1873_v50, %v4632_v47  ;;  %v1892_v2 = vrot.slane %v1882_v41, %v4632_v47  ;;  %v5145_v49 = vmul.f32 %v2463_v14, %v5037_v24 }
 0x2ca   : > { %vm5134_vm7 = vcmp.lt.f32.partialorder %v5613_v9, 0.0004427343  ;;  %v5148_v6 = vmul.f32 %v2148_v63, %v5026_v27  ;;  %v2513_v51 = vadd.f32 1.0, %v5119_v62  ;;  %v2252_v11 = vadd.f32 1.0, %v5091_v28 }
 0x2cb   : > { %v5153_v20 = vmul.f32 -0.5, %v5119_v62  ;;  %v1893_v10 = vsel %vm1460_vm1, %v1892_v2, %v1888_v36  ;;  %v1927_v37 = vsel %vm5071_vm0, %v4828_v17, %v4900_v54  ;;  %v1936_v27 = vsel %vm5075_vm4, %v5016_v45, %v1930_v61  ;;  %v4159_v41 = vpop.eup %4158 }
 0x2cc   : > { %v5121_v16 = vpop.xlane.xlu1 %2295  ;;  %v5165_v63 = vmul.f32 0.6931472, %v4155_v56  ;;  %v2202_v21 = vadd.f32 1.0, %v2201_v43  ;;  %v1895_v50 = vsel %vm1463_vm2, %v1893_v10, 0.0  ;;  %4168 = vlog2.f32 %v2252_v11 }
 0x2cd   : > { %v5618_v9 = vand.u32 2147483647, %v4795_v5  ;;  %vm5174_vm10 = vcmp.lt.f32.partialorder %v2096_v34, 0.0004427343  ;;  %1896 = vadd.xlane.f32.xlu0 %v1895_v50  ;;  %v2255_v54 = vmul.f32 -0.5, %v5091_v28  ;;  %v1942_v45 = vrot.slane %v1927_v37, %v4632_v47  ;;  %v4161_v43 = vpop.eup %4160 }
 0x2ce   : > { %v1946_v19 = vrot.slane %v1936_v27, %v4632_v47  ;;  %v2306_v46 = vadd.f32 1.0, %v5121_v16  ;;  %v2038_v61 = vmul.f32 0.6931472, %v4157_v57  ;;  %4170 = vlog2.f32 %v2513_v51 }
 0x2cf   : > { %vm5170_vm9 = vcmp.lt.f32.partialorder %v5618_v9, 0.0004427343  ;;  %v1981_v5 = vsel %vm5098_vm5, %v4864_v39, %v4910_v12  ;;  %v1990_v34 = vsel %vm5102_vm6, %v5052_v48, %v1984_v35  ;;  %v2204_v56 = vand.u32 2147483647, %v5057_v3  ;;  %v4163_v35 = vpop.eup %4162 }
 0x2d0   : > { %v5163_v14 = vpop.xlane.xlu1 %2349  ;;  %v1947_v2 = vsel %vm1460_vm1, %v1946_v19, %v1942_v45  ;;  %4172 = vlog2.f32 %v2306_v46  ;;  %v2309_v11 = vmul.f32 -0.5, %v5121_v16  ;;  %v5623_v51 = vand.u32 2147483647, %v4821_v13 }
 0x2d1   : > { %v5200_v39 = vmul.f32 0.6931472, %v4159_v41  ;;  %vm5202_vm12 = vcmp.lt.f32.partialorder %v2150_v58, 0.0004427343  ;;  %v5207_v48 = vmul.f32 %v2202_v21, %v5057_v3  ;;  %v2258_v38 = vand.u32 2147483647, %v5091_v28  ;;  %v4165_v58 = vpop.eup %4164 }
 0x2d2   : > { %vm5196_vm11 = vcmp.lt.f32.partialorder %v5623_v51, 0.0004427343  ;;  %v1949_v7 = vsel %vm1463_vm2, %v1947_v2, 0.0  ;;  %v2256_v37 = vadd.f32 1.0, %v2255_v54  ;;  %v1996_v13 = vrot.slane %v1981_v5, %v4632_v47 }
 0x2d3   : > { %1950 = vadd.xlane.f32.xlu1 %v1949_v7  ;;  %v2000_v27 = vrot.slane %v1990_v34, %v4632_v47  ;;  %v2360_v50 = vadd.f32 1.0, %v5163_v14  ;;  %v2092_v41 = vmul.f32 0.6931472, %v4161_v43  ;;  %v2035_v3 = vsel %vm5134_vm7, %v4890_v32, %v4933_v55 }
 0x2d4   : > { %v5192_v10 = vpop.xlane.xlu1 %2403  ;;  %v2044_v21 = vsel %vm5138_vm8, %v5080_v40, %v2038_v61  ;;  %v5628_v54 = vand.u32 2147483647, %v4850_v59  ;;  %v2310_v19 = vadd.f32 1.0, %v2309_v11  ;;  %v2312_v46 = vand.u32 2147483647, %v5121_v16 }
 0x2d5   : > { %v2414_v9 = vadd.f32 1.0, %v5192_v10  ;;  %v2001_v5 = vsel %vm1460_vm1, %v2000_v27, %v1996_v13  ;;  %4174 = vlog2.f32 %v2360_v50  ;;  %vm5232_vm14 = vcmp.lt.f32.partialorder %v2204_v56, 0.0004427343 }
 0x2d6   : > { %vm5224_vm13 = vcmp.lt.f32.partialorder %v5628_v54, 0.0004427343  ;;  %v2003_v55 = vsel %vm1463_vm2, %v2001_v5, 0.0  ;;  %v2363_v59 = vmul.f32 -0.5, %v5163_v14  ;;  %v2050_v40 = vrot.slane %v2035_v3, %v4632_v47  ;;  %v4167_v2 = vpop.eup %4166 }
 0x2d7   : > { %v2054_v18 = vrot.slane %v2044_v21, %v4632_v47  ;;  %v5240_v61 = vmul.f32 0.6931472, %v4163_v35  ;;  %v2146_v34 = vmul.f32 0.6931472, %v4165_v58  ;;  %v2257_v43 = vmul.f32 %v2256_v37, %v5091_v28  ;;  %2004 = vadd.xlane.f32.xlu0 %v2003_v55 }
 0x2d8   : > { %v5230_v31 = vpop.xlane.xlu1 %2457  ;;  %4176 = vlog2.f32 %v2414_v9  ;;  %v5633_v56 = vand.u32 2147483647, %v4887_v23  ;;  %v5636_v51 = vand.u32 2147483647, %v4922_v33  ;;  %vm5255_vm4 = vcmp.lt.f32.partialorder %v2258_v38, 0.0004427343 }
 0x2d9   : > { %v2055_v28 = vsel %vm1460_vm1, %v2054_v18, %v2050_v40  ;;  %v2417_v37 = vmul.f32 -0.5, %v5192_v10  ;;  %v2089_v23 = vsel %vm5170_vm9, %v4914_v8, %v4963_v22  ;;  %v2098_v33 = vsel %vm5174_vm10, %v5115_v25, %v2092_v41  ;;  %v4169_v25 = vpop.eup %4168 }
 0x2da   : > { %vm5245_vm15 = vcmp.lt.f32.partialorder %v5633_v56, 0.0004427343  ;;  %vm5251_vm0 = vcmp.lt.f32.partialorder %v5636_v51, 0.0004427343  ;;  %vm5268_vm5 = vcmp.lt.f32.partialorder %v2312_v46, 0.0004427343  ;;  %v2104_v27 = vrot.slane %v2089_v23, %v4632_v47 }
 0x2db   : > { %v2057_v38 = vsel %vm1463_vm2, %v2055_v28, 0.0  ;;  %v2108_v50 = vrot.slane %v2098_v33, %v4632_v47  ;;  %v2311_v58 = vmul.f32 %v2310_v19, %v5121_v16  ;;  %v2364_v3 = vadd.f32 1.0, %v2363_v59  ;;  %v4171_v55 = vpop.eup %4170 }
 0x2dc   : > { %v2366_v36 = vand.u32 2147483647, %v5163_v14  ;;  %2058 = vadd.xlane.f32.xlu1 %v2057_v38  ;;  %v2468_v8 = vadd.f32 1.0, %v5230_v31  ;;  %v5278_v22 = vpop.xlane.xlu1 %2511  ;;  %v5643_v17 = vand.u32 2147483647, %v4956_v44  ;;  %v2143_v19 = vsel %vm5196_vm11, %v4945_v52, %v4997_v29 }
 0x2dd   : > { %v5646_v21 = vand.u32 2147483647, %v4993_v0  ;;  %v2200_v16 = vmul.f32 0.6931472, %v4167_v2  ;;  %v2109_v54 = vsel %vm1460_vm1, %v2108_v50, %v2104_v27  ;;  %v2152_v44 = vsel %vm5202_vm12, %v5148_v6, %v2146_v34  ;;  %v4173_v52 = vpop.eup %4172 }
 0x2de   : > { %vm5282_vm6 = vcmp.lt.f32.partialorder %v5643_v17, 0.0004427343  ;;  %v2418_v46 = vadd.f32 1.0, %v2417_v37  ;;  %v2111_v5 = vsel %vm1463_vm2, %v2109_v54, 0.0  ;;  %4178 = vlog2.f32 %v2468_v8 }
 0x2df   : > { %vm5288_vm7 = vcmp.lt.f32.partialorder %v5646_v21, 0.0004427343  ;;  %v2471_v0 = vmul.f32 -0.5, %v5230_v31  ;;  %v2254_v59 = vmul.f32 0.6931472, %v4169_v25  ;;  %2112 = vadd.xlane.f32.xlu0 %v2111_v5  ;;  %v2158_v40 = vrot.slane %v2143_v19, %v4632_v47 }
 0x2e0   : > { %v2162_v18 = vrot.slane %v2152_v44, %v4632_v47  ;;  %v2522_v57 = vadd.f32 1.0, %v5278_v22  ;;  %v2365_v29 = vmul.f32 %v2364_v3, %v5163_v14  ;;  %vm5306_vm8 = vcmp.lt.f32.partialorder %v2366_v36, 0.0004427343 }
 0x2e1   : > { %v2420_v12 = vand.u32 2147483647, %v5192_v10  ;;  %v2197_v34 = vsel %vm5224_vm13, %v4976_v15, %v5021_v53  ;;  %v2308_v2 = vmul.f32 0.6931472, %v4173_v52  ;;  %v2206_v51 = vsel %vm5232_vm14, %v5207_v48, %v2200_v16  ;;  %v5651_v48 = vld [vmem:[#allocation6_spill] sm:$0xff] }
 0x2e2   : > { %v2163_v56 = vsel %vm1460_vm1, %v2162_v18, %v2158_v40  ;;  %4180 = vlog2.f32 %v2522_v57  ;;  %v2419_v14 = vmul.f32 %v2418_v46, %v5192_v10  ;;  %v2472_v28 = vadd.f32 1.0, %v2471_v0  ;;  %v4175_v45 = vpop.eup %4174 }
 0x2e3   : > { %v2165_v37 = vsel %vm1463_vm2, %v2163_v56, 0.0  ;;  %v2212_v23 = vrot.slane %v2197_v34, %v4632_v47  ;;  %v2216_v33 = vrot.slane %v2206_v51, %v4632_v47  ;;  %v2251_v15 = vsel %vm5245_vm15, %v4989_v42, %v5062_v26 }
 0x2e4   : > { %2166 = vadd.xlane.f32.xlu1 %v2165_v37  ;;  %v2260_v53 = vsel %vm5255_vm4, %v2257_v43, %v2254_v59  ;;  %v2305_v10 = vsel %vm5251_vm0, %v5651_v48, %v5108_v30  ;;  %v2525_v32 = vmul.f32 -0.5, %v5278_v22  ;;  %v2266_v38 = vrot.slane %v2251_v15, %v4632_v47 }
 0x2e5   : > { %v2270_v27 = vrot.slane %v2260_v53, %v4632_v47  ;;  %v2314_v50 = vsel %vm5268_vm5, %v2311_v58, %v2308_v2  ;;  %v2362_v11 = vmul.f32 0.6931472, %v4175_v45  ;;  %v2217_v42 = vsel %vm1460_vm1, %v2216_v33, %v2212_v23  ;;  %v4177_v35 = vpop.eup %4176 }
 0x2e6   : > { %v2320_v26 = vrot.slane %v2305_v10, %v4632_v47  ;;  %v2324_v43 = vrot.slane %v2314_v50, %v4632_v47  ;;  %v2219_v30 = vsel %vm1463_vm2, %v2217_v42, 0.0  ;;  %v2359_v3 = vsel %vm5282_vm6, %v5065_v4, %v5165_v63 }
 0x2e7   : > { %v2271_v7 = vsel %vm1460_vm1, %v2270_v27, %v2266_v38  ;;  %v2413_v13 = vsel %vm5288_vm7, %v5112_v1, %v5200_v39  ;;  %v2416_v58 = vmul.f32 0.6931472, %v4177_v35  ;;  %2220 = vadd.xlane.f32.xlu0 %v2219_v30  ;;  %v2368_v25 = vsel %vm5306_vm8, %v2365_v29, %v2362_v11  ;;  %v3596_v11 = vld [vmem:[%s5552_s2 + $0x1] ss:$0 sm:$0xff] }
 0x2e8   : > { %v2273_v36 = vsel %vm1463_vm2, %v2271_v7, 0.0  ;;  %v2325_v8 = vsel %vm1460_vm1, %v2324_v43, %v2320_v26  ;;  %vm2421_vm9 = vcmp.lt.f32.partialorder %v2420_v12, 0.0004427343  ;;  %v2374_v4 = vrot.slane %v2359_v3, %v4632_v47  ;;  %v3593_v26 = vld [vmem:[%s5552_s2] ss:$0 sm:$0xff] }
 0x2e9   : > { %2274 = vadd.xlane.f32.xlu1 %v2273_v36  ;;  %v2327_v17 = vsel %vm1463_vm2, %v2325_v8, 0.0  ;;  %v2378_v63 = vrot.slane %v2368_v25, %v4632_v47  ;;  %v2517_v41 = vadd.f32 1.0, %v5153_v20  ;;  %v2519_v1 = vand.u32 2147483647, %v5119_v62  ;;  %v3599_v43 = vld [vmem:[%s5552_s2 + $0x2] ss:$0 sm:$0xff] }
 0x2ea   : > { %v2474_v39 = vand.u32 2147483647, %v5230_v31  ;;  %v2422_v21 = vsel %vm2421_vm9, %v2419_v14, %v2416_v58  ;;  %v2526_v9 = vadd.f32 1.0, %v2525_v32  ;;  %v2428_v54 = vrot.slane %v2413_v13, %v4632_v47  ;;  %v2563_v14 = vld [vmem:[%s5554_s4 + $0x8] sm:$0x3] }
 0x2eb   : > { %v2379_v16 = vsel %vm1460_vm1, %v2378_v63, %v2374_v4  ;;  %v2432_v19 = vrot.slane %v2422_v21, %v4632_v47  ;;  %v4179_v44 = vpop.eup %4178  ;;  %vm5366_vm10 = vcmp.lt.f32.partialorder %v2465_v60, 0.0004427343  ;;  %v2515_v20 = vmul.f32 0.6931472, %v4171_v55  ;;  %2328 = vadd.xlane.f32.xlu0 %v2327_v17  ;;  %v3602_v7 = vld [vmem:[%s5552_s2 + $0x3] ss:$0 sm:$0xff] }
 0x2ec   : > { %v2473_v5 = vmul.f32 %v2472_v28, %v5230_v31  ;;  %v2381_v0 = vsel %vm1463_vm2, %v2379_v16, 0.0  ;;  %v2470_v59 = vmul.f32 0.6931472, %v4179_v44  ;;  %v2528_v40 = vand.u32 2147483647, %v5278_v22  ;;  %v2562_v28 = vld [vmem:[%s5554_s4] sm:$0xff] }
 0x2ed   : > { %2382 = vadd.xlane.f32.xlu1 %v2381_v0  ;;  %v2433_v18 = vsel %vm1460_vm1, %v2432_v19, %v2428_v54  ;;  %v2467_v24 = vsel %vm5366_vm10, %v5145_v49, %v5240_v61  ;;  %v2518_v60 = vmul.f32 %v2517_v41, %v5119_v62  ;;  %vm2475_vm11 = vcmp.lt.f32.partialorder %v2474_v39, 0.0004427343  ;;  %v3605_v36 = vld [vmem:[%s5552_s2 + $0x4] ss:$0 sm:$0xff]  ;;  %v3608_v4 = vld [vmem:[%s5552_s2 + $0x5] ss:$0 sm:$0xff] }
 0x2ee   : > { %v2435_v55 = vsel %vm1463_vm2, %v2433_v18, 0.0  ;;  %vm2520_vm12 = vcmp.lt.f32.partialorder %v2519_v1, 0.0004427343  ;;  %v2527_v57 = vmul.f32 %v2526_v9, %v5278_v22  ;;  %v2476_v52 = vsel %vm2475_vm11, %v2473_v5, %v2470_v59  ;;  %v3611_v39 = vld [vmem:[%s5552_s2 + $0x6] ss:$0 sm:$0xff] }
 0x2ef   : > { %v4181_v31 = vpop.eup %4180  ;;  %2436 = vadd.xlane.f32.xlu0 %v2435_v55  ;;  %v2482_v6 = vrot.slane %v2467_v24, %v4632_v47  ;;  %v2486_v12 = vrot.slane %v2476_v52, %v4632_v47  ;;  %v2521_v34 = vsel %vm2520_vm12, %v2518_v60, %v2515_v20  ;;  %vm2529_vm13 = vcmp.lt.f32.partialorder %v2528_v40, 0.0004427343  ;;  %v3614_v54 = vld [vmem:[%s5552_s2 + $0x7] ss:$0 sm:$0xff]  ;;  %v3617_v20 = vld [vmem:[%s5552_s2 + $0x8] ss:$0 sm:$0xff] }
 0x2f0   : > { %v2524_v29 = vmul.f32 0.6931472, %v4181_v31  ;;  %v2536_v2 = vrot.slane %v2521_v34, %v4632_v47  ;;  %vm2575_vm14 = vcmask 1041408   ;;  %v5395_v23 = vand.u32 4294901760, %v2562_v28  ;;  %v3620_v40 = vld [vmem:[%s5552_s2 + $0x9] ss:$0 sm:$0xff] }
 0x2f1   : > { %v2487_v49 = vsel %vm1460_vm1, %v2486_v12, %v2482_v6  ;;  %v2577_v37 = vsel %vm2575_vm14, %v2563_v14, 0  ;;  %v5654_v48 = vmov 0.0   ;;  %v3623_v55 = vld [vmem:[%s5552_s2 + $0xa] ss:$0 sm:$0xff]  ;;  %vm3047_vm15 = vcmask 39936  }
 0x2f2   : > { %v2530_v61 = vsel %vm2529_vm13, %v2527_v57, %v2524_v29  ;;  %v2489_v62 = vsel %vm1463_vm2, %v2487_v49, 0.0  ;;  %v5397_v33 = vand.u32 4294901760, %v2577_v37  ;;  %v3626_v29 = vld [vmem:[%s5552_s2 + $0xb] ss:$0 sm:$0xff]  ;;  %v3629_v49 = vld [vmem:[%s5552_s2 + $0xc] ss:$0 sm:$0xff] }
 0x2f3   : > { %v2540_v56 = vrot.slane %v2530_v61, %v4632_v47  ;;  %2490 = vadd.xlane.f32.xlu1 %v2489_v62  ;;  %v5400_v47 = vsub.f32 %v2562_v28, %v5395_v23  ;;  %v3635_v28 = vld [vmem:[%s5552_s2 + $0xe] ss:$0 sm:$0xff] }
 0x2f4   : > { %v5403_v15 = vsub.f32 %v2577_v37, %v5397_v33  ;;  %3884 = vmatpush3.msra.mxu0 %v5397_v33 }
 0x2f5   : > { %v2541_v22 = vsel %vm1460_vm1, %v2540_v56, %v2536_v2  ;;  %v2694_v53 = vand.u32 4294901760, %v5400_v47  ;;  %3885 = vmatprep.subr.mxu0 %v5654_v48  ;;  %v3632_v56 = vld [vmem:[%s5552_s2 + $0xd] ss:$0 sm:$0xff]  ;;  %vm2571_vm1 = vcmask 80896  }
 0x2f6   : > { %v2543_v51 = vsel %vm1463_vm2, %v2541_v22, 0.0  ;;  %v2687_v10 = vand.u32 4294901760, %v5403_v15  ;;  %3886 = vmatpush3.msra.mxu0 %v5395_v23  ;;  %vm3051_vm2 = vcmask 1044480  }
 0x2f7   : > { %2544 = vadd.xlane.f32.xlu0 %v2543_v51  ;;  %v2695_v45 = vsub.f32 %v5400_v47, %v2694_v53  ;;  %3897 = vmatprep.subr.mxu0 %v5654_v48 }
 0x2f8   : > { %v2688_v32 = vsub.f32 %v5403_v15, %v2687_v10 }
 0x2f9   : > { %v2696_v27 = vand.u32 4294901760, %v2695_v45 }
 0x2fa   : > { %v2689_v38 = vand.u32 4294901760, %v2688_v32 }
 0x2fc   : > { %3891 = vmatpush3.msra.mxu1 %v2689_v38  ;;  %v3638_v38 = vld [vmem:[%s5552_s2 + $0xf] ss:$0 sm:$0xff] }
 0x2fd   : > { %3892 = vmatprep.subr.mxu1 %v5654_v48 }
 0x2fe   : > { %3893 = vmatpush3.msra.mxu1 %v2696_v27 }
 0x2ff   : > { %3904 = vmatprep.subr.mxu1 %v5654_v48 }
 0x32d   : > { %v1466_v50 = vpop.xlane.xlu0 %1465 }
 0x32e   : > { %v1472_v13 = vmul.f32 %v3593_v26, %v1466_v50 }
 0x331   : > { %v1519_v42 = vpop.xlane.xlu1 %1518 }
 0x332   : > { %v1525_v30 = vmul.f32 %v3596_v11, %v1519_v42  ;;  %v3641_v42 = vld [vmem:[%s5552_s2 + $0x10] ss:$0 sm:$0xff] }
 0x334   : > { %v1526_v25 = vadd.f32 %v1525_v30, %v1472_v13  ;;  %v3644_v30 = vld [vmem:[%s5552_s2 + $0x11] ss:$0 sm:$0xff] }
 0x335   : > { %v1573_v35 = vpop.xlane.xlu0 %1572 }
 0x336   : > { %v1579_v58 = vmul.f32 %v3599_v43, %v1573_v35 }
 0x338   : > { %v1580_v41 = vadd.f32 %v1579_v58, %v1526_v25  ;;  %v3647_v58 = vld [vmem:[%s5552_s2 + $0x12] ss:$0 sm:$0xff] }
 0x339   : > { %v1627_v3 = vpop.xlane.xlu1 %1626 }
 0x33a   : > { %v1633_v17 = vmul.f32 %v3602_v7, %v1627_v3 }
 0x33c   : > { %v1634_v9 = vadd.f32 %v1633_v17, %v1580_v41 }
 0x33e   : > { %v1681_v8 = vpop.xlane.xlu0 %1680 }
 0x33f   : > { %v1687_v1 = vmul.f32 %v3605_v36, %v1681_v8 }
 0x341   : > { %v1688_v44 = vadd.f32 %v1687_v1, %v1634_v9 }
 0x344   : > { %v1735_v63 = vpop.xlane.xlu1 %1734 }
 0x345   : > { %v1741_v16 = vmul.f32 %v3608_v4, %v1735_v63  ;;  %v3650_v63 = vld [vmem:[%s5552_s2 + $0x13] ss:$0 sm:$0xff] }
 0x347   : > { %v1742_v0 = vadd.f32 %v1741_v16, %v1688_v44  ;;  %v3654_v44 = vld [vmem:[%s5553_s3] ss:$0 sm:$0xff] }
 0x349   : > { %v1789_v21 = vpop.xlane.xlu0 %1788 }
 0x34a   : > { %v1795_v46 = vmul.f32 %v3611_v39, %v1789_v21  ;;  %v3653_v21 = vld [vmem:[%s5552_s2 + $0x14] ss:$0 sm:$0xff] }
 0x34c   : > { %v1796_v24 = vadd.f32 %v1795_v46, %v1742_v0 }
 0x351   : > { %v1843_v19 = vpop.xlane.xlu1 %1842 }
 0x352   : > { %v1849_v59 = vmul.f32 %v3614_v54, %v1843_v19 }
 0x354   : > { %v1850_v57 = vadd.f32 %v1849_v59, %v1796_v24 }
 0x356   : > { %v1897_v5 = vpop.xlane.xlu0 %1896 }
 0x357   : > { %v1903_v60 = vmul.f32 %v3617_v20, %v1897_v5 }
 0x359   : > { %v1904_v12 = vadd.f32 %v1903_v60, %v1850_v57 }
 0x35c   : > { %v1951_v18 = vpop.xlane.xlu1 %1950 }
 0x35d   : > { %v1957_v52 = vmul.f32 %v3620_v40, %v1951_v18 }
 0x35f   : > { %v1958_v62 = vadd.f32 %v1957_v52, %v1904_v12 }
 0x360   : > { %v2005_v31 = vpop.xlane.xlu0 %2004 }
 0x361   : > { %v2011_v34 = vmul.f32 %v3623_v55, %v2005_v31 }
 0x363   : > { %v2012_v51 = vadd.f32 %v2011_v34, %v1958_v62 }
 0x365   : > { %v2059_v6 = vpop.xlane.xlu1 %2058 }
 0x366   : > { %v2065_v2 = vmul.f32 %v3626_v29, %v2059_v6  ;;  %v3655_v6 = vld [vmem:[%s5555_s5] ss:$0 sm:$0xff] }
 0x368   : > { %v2113_v61 = vpop.xlane.xlu0 %2112  ;;  %v2066_v37 = vadd.f32 %v2065_v2, %v2012_v51 }
 0x369   : > { %v2119_v14 = vmul.f32 %v3629_v49, %v2113_v61 }
 0x36b   : > { %v2120_v50 = vadd.f32 %v2119_v14, %v2066_v37 }
 0x36d   : > { %v2167_v22 = vpop.xlane.xlu1 %2166 }
 0x36e   : > { %v2173_v45 = vmul.f32 %v3632_v56, %v2167_v22 }
 0x370   : > { %v2221_v32 = vpop.xlane.xlu0 %2220  ;;  %v2174_v26 = vadd.f32 %v2173_v45, %v2120_v50 }
 0x371   : > { %v2227_v11 = vmul.f32 %v3635_v28, %v2221_v32 }
 0x372   : > { %v2275_v27 = vpop.xlane.xlu1 %2274 }
 0x373   : > { %v2281_v43 = vmul.f32 %v3638_v38, %v2275_v27  ;;  %v2228_v3 = vadd.f32 %v2227_v11, %v2174_v26 }
 0x374   : > { %v2329_v35 = vpop.xlane.xlu0 %2328 }
 0x375   : > { %v2335_v13 = vmul.f32 %v3641_v42, %v2329_v35  ;;  %v2282_v36 = vadd.f32 %v2281_v43, %v2228_v3 }
 0x376   : > { %v2383_v7 = vpop.xlane.xlu1 %2382 }
 0x377   : > { %v2389_v8 = vmul.f32 %v3644_v30, %v2383_v7  ;;  %v2336_v17 = vadd.f32 %v2335_v13, %v2282_v36  ;;  %v3656_v13 = vld [vmem:[#allocation2] ss:$0 sm:$0xff] }
 0x378   : > { %v2437_v25 = vpop.xlane.xlu0 %2436 }
 0x379   : > { %v2443_v4 = vmul.f32 %v3647_v58, %v2437_v25  ;;  %v2390_v41 = vadd.f32 %v2389_v8, %v2336_v17 }
 0x37b   : > { %v2444_v9 = vadd.f32 %v2443_v4, %v2390_v41 }
 0x37c   : > { %v2491_v1 = vpop.xlane.xlu1 %2490 }
 0x37d   : > { %v2497_v39 = vmul.f32 %v3650_v63, %v2491_v1 }
 0x37f   : > { %v2498_v54 = vadd.f32 %v2497_v39, %v2444_v9 }
 0x380   : > { %v2545_v16 = vpop.xlane.xlu0 %2544 }
 0x381   : > { %v2551_v19 = vmul.f32 %v3653_v21, %v2545_v16 }
 0x383   : > { %v2552_v46 = vadd.f32 %v2551_v19, %v2498_v54 }
 0x385   : > { %v2560_v20 = vadd.f32 %v3654_v44, %v2552_v46 }
 0x387   : > { %v2561_v5 = vmax.f32 %v2560_v20, 0.0 }
 0x389   : > { %v2573_v0 = vsel %vm2571_vm1, %v2561_v5, 0 }
 0x38a   : > { %v2646_v59 = vand.u32 4294901760, %v2573_v0 }
 0x38c   : > { %3895 = vmatmul.mubr.f32.vlgmr.msra.gmra.mxu1 %v2646_v59  ;;  %v2647_v40 = vsub.f32 %v2573_v0, %v2646_v59 }
 0x38d   : > { %3905 = vmatpush3.msra.mxu1 %v5397_v33  ;;  %3908 = vmatprep.mubr.msk.f32.mxu1 %vm4250_vm3, %v5654_v48 }
 0x38e   : > { %3906 = vmatprep.subr.mxu1 %v5654_v48  ;;  %v2648_v18 = vand.u32 4294901760, %v2647_v40 }
 0x38f   : > { %3907 = vmatpush3.msra.mxu1 %v5395_v23 }
 0x390   : > { %3909 = vmatmul.mubr.f32.vlgmr.msra.gmra.mxu1 %v2648_v18  ;;  %3918 = vmatprep.subr.mxu1 %v5654_v48  ;;  %v2649_v24 = vsub.f32 %v2647_v40, %v2648_v18 }
 0x391   : > { %3919 = vmatpush3.msra.mxu1 %v5397_v33  ;;  %3922 = vmatprep.mubr.msk.f32.mxu1 %vm4250_vm3, %v5654_v48 }
 0x392   : > { %3920 = vmatprep.subr.mxu1 %v5654_v48  ;;  %v2650_v60 = vand.u32 4294901760, %v2649_v24 }
 0x393   : > { %3921 = vmatpush3.msra.mxu1 %v5395_v23  ;;  %v3039_v23 = vld [vmem:[%s5556_s6] sm:$0x1f] }
 0x394   : > { %3888 = vmatmul.mubr.f32.vlgmr.msra.gmra.mxu0 %v2650_v60  ;;  %3923 = vmatmul.mubr.f32.vlgmr.msra.gmra.mxu1 %v2646_v59  ;;  %v3053_v33 = vsel %vm3051_vm2, %v3039_v23, 0 }
 0x395   : > { %3898 = vmatpush3.msra.mxu0 %v5403_v15  ;;  %3901 = vmatprep.mubr.msk.f32.mxu0 %vm4250_vm3, %v5654_v48  ;;  %v3086_v15 = vand.u32 4294901760, %v3053_v33 }
 0x396   : > { %3899 = vmatprep.subr.mxu0 %v5654_v48  ;;  %3930 = vmatprep.subr.mxu1 %v5654_v48 }
 0x397   : > { %3900 = vmatpush3.msra.mxu0 %v5400_v47  ;;  %3932 = vmatprep.mubr.msk.f32.mxu1 %vm4250_vm3, %v5654_v48 }
 0x398   : > { %3911 = vmatprep.subr.mxu0 %v5654_v48  ;;  %3902 = vmatmul.mubr.f32.vlgmr.msra.gmra.mxu0 %v2647_v40 }
 0x399   : > { %3912 = vmatpush3.msra.mxu0 %v2687_v10  ;;  %3915 = vmatprep.mubr.msk.f32.mxu0 %vm4250_vm3, %v5654_v48  ;;  %v3163_v10 = vsub.f32 %v3053_v33, %v3086_v15 }
 0x39a   : > { %3913 = vmatprep.subr.mxu0 %v5654_v48 }
 0x39b   : > { %3914 = vmatpush3.msra.mxu0 %v2694_v53  ;;  %v3164_v55 = vand.u32 4294901760, %v3163_v10 }
 0x39c   : > { %3916 = vmatmul.mubr.f32.vlgmr.msra.gmra.mxu0 %v2646_v59  ;;  %3925 = vmatprep.subr.mxu0 %v5654_v48 }
 0x39d   : > { %3927 = vmatprep.mubr.msk.f32.mxu0 %vm4250_vm3, %v5654_v48  ;;  %3926 = vmatpush3.msra.mxu0 %v3086_v15  ;;  %v3165_v47 = vsub.f32 %v3163_v10, %v3164_v55 }
 0x39e   : > { %3935 = vmatprep.subr.mxu0 %v5654_v48 }
 0x39f   : > { %v3166_v53 = vand.u32 4294901760, %v3165_v47 }
 0x3a1   : > { %3931 = vmatpush3.msra.mxu1 %v3166_v53 }
 0x3a2   : > { %3940 = vmatprep.subr.mxu1 %v5654_v48 }
 0x44c   : > { %v2733_v31 = vpop.f32.mrf.mxu1 }
 0x44e   : > { %v3896_v57 = vpop.f32.mrf.mxu1 }
 0x450   : > { %v2884_v52 = vpop.f32.mrf.mxu1 }
 0x452   : > { %v3910_v29 = vpop.f32.mrf.mxu1 }
 0x454   : > { %v2652_v12 = vpop.f32.mrf.mxu0  ;;  %v3034_v34 = vpop.f32.mrf.mxu1 }
 0x455   : > { %v2653_v49 = vadd.f32 %v3655_v6, %v2652_v12 }
 0x456   : > { %v3889_v61 = vpop.f32.mrf.mxu0  ;;  %v3924_v62 = vpop.f32.mrf.mxu1 }
 0x457   : > { %v2734_v2 = vadd.f32 %v2733_v31, %v2653_v49 }
 0x458   : > { %v2809_v56 = vpop.f32.mrf.mxu0 }
 0x459   : > { %v2810_v22 = vadd.f32 %v2809_v56, %v2734_v2 }
 0x45a   : > { %v3903_v51 = vpop.f32.mrf.mxu0 }
 0x45b   : > { %v2885_v14 = vadd.f32 %v2884_v52, %v2810_v22 }
 0x45c   : > { %v2961_v28 = vpop.f32.mrf.mxu0 }
 0x45d   : > { %v2962_v37 = vadd.f32 %v2961_v28, %v2885_v14 }
 0x45e   : > { %v3917_v45 = vpop.f32.mrf.mxu0 }
 0x45f   : > { %v3035_v32 = vadd.f32 %v3034_v34, %v2962_v37 }
 0x461   : > { %v3038_v38 = vmax.f32 %v3035_v32, 0.0 }
 0x463   : > { %v3049_v27 = vsel %vm3047_vm15, %v3038_v38, 0 }
 0x464   : > { %v3121_v50 = vand.u32 4294901760, %v3049_v27 }
 0x466   : > { %v3122_v11 = vsub.f32 %v3049_v27, %v3121_v50  ;;  %3933 = vmatmul.mubr.f32.vlgmr.msra.gmra.mxu1 %v3121_v50 }
 0x467   : > { %3941 = vmatpush3.msra.mxu1 %v3086_v15  ;;  %3942 = vmatprep.mubr.msk.f32.mxu1 %vm4250_vm3, %v5654_v48 }
 0x468   : > { %v3123_v42 = vand.u32 4294901760, %v3122_v11  ;;  %3950 = vmatprep.subr.mxu1 %v5654_v48 }
 0x46a   : > { %3943 = vmatmul.mubr.f32.vlgmr.msra.gmra.mxu1 %v3123_v42  ;;  %v3124_v26 = vsub.f32 %v3122_v11, %v3123_v42 }
 0x46b   : > { %3951 = vmatpush3.msra.mxu1 %v3086_v15  ;;  %3952 = vmatprep.mubr.msk.f32.mxu1 %vm4250_vm3, %v5654_v48 }
 0x46c   : > { %v3125_v43 = vand.u32 4294901760, %v3124_v26 }
 0x46e   : > { %3928 = vmatmul.mubr.f32.vlgmr.msra.gmra.mxu0 %v3125_v43  ;;  %3953 = vmatmul.mubr.f32.vlgmr.msra.gmra.mxu1 %v3121_v50 }
 0x46f   : > { %3936 = vmatpush3.msra.mxu0 %v3163_v10  ;;  %3937 = vmatprep.mubr.msk.f32.mxu0 %vm4250_vm3, %v5654_v48 }
 0x470   : > { %3945 = vmatprep.subr.mxu0 %v5654_v48 }
 0x472   : > { %3938 = vmatmul.mubr.f32.vlgmr.msra.gmra.mxu0 %v3122_v11 }
 0x473   : > { %3946 = vmatpush3.msra.mxu0 %v3164_v55  ;;  %3947 = vmatprep.mubr.msk.f32.mxu0 %vm4250_vm3, %v5654_v48  ;;  %vm3501_vm3 = vcmask 1024  }
 0x476   : > { %3948 = vmatmul.mubr.f32.vlgmr.msra.gmra.mxu0 %v3121_v50 }
 0x526   : > { %v3203_v35 = vpop.f32.mrf.mxu1 }
 0x528   : > { %v3934_v30 = vpop.f32.mrf.mxu1 }
 0x52a   : > { %v3351_v7 = vpop.f32.mrf.mxu1 }
 0x52c   : > { %v3944_v3 = vpop.f32.mrf.mxu1 }
 0x52e   : > { %v3127_v58 = vpop.f32.mrf.mxu0  ;;  %v3497_v36 = vpop.f32.mrf.mxu1 }
 0x52f   : > { %v3128_v8 = vadd.f32 %v3656_v13, %v3127_v58 }
 0x530   : > { %v3929_v25 = vpop.f32.mrf.mxu0  ;;  %v3954_v17 = vpop.f32.mrf.mxu1 }
 0x531   : > { %v3204_v4 = vadd.f32 %v3203_v35, %v3128_v8 }
 0x532   : > { %v3277_v63 = vpop.f32.mrf.mxu0 }
 0x533   : > { %v3278_v41 = vadd.f32 %v3277_v63, %v3204_v4 }
 0x534   : > { %v3939_v1 = vpop.f32.mrf.mxu0 }
 0x535   : > { %v3352_v39 = vadd.f32 %v3351_v7, %v3278_v41 }
 0x536   : > { %v3425_v21 = vpop.f32.mrf.mxu0 }
 0x537   : > { %v3426_v48 = vadd.f32 %v3425_v21, %v3352_v39 }
 0x538   : > { %v3949_v9 = vpop.f32.mrf.mxu0 }
 0x539   : > { %v3498_v16 = vadd.f32 %v3497_v36, %v3426_v48 }
 0x53b   : > { %3502 = vst.msk [vmem:[%s345_s25] sm:$0x3] %vm3501_vm3, %v3498_v16 }
 0x53c PF: > { %p20_p9 = scmp.ge.s32.totalorder %s4321_s11, 4   ;;  %s5655_s29 = smov %s4236_s30 }
 0x53d   : > { %s5656_s30 = smov %s4240_s9  ;;  %s5657_s9 = smov %s4331_s14 }
 0x53e   : > { %s5658_s10 = smov %s4321_s11  ;;  %22 = sbr.rel (!%p20_p9) target bundleno = 6 (0x6), region = 95 }
 0x543   :  { %3522 = vsyncpa [#allocation4], 1 }
 0x544   :  { %3524 = vsyncpa [#allocation4 + $0x1], 1 }

</bundles_post_ra>
